<compile_context>
chip_gen: v6e
topology: v6e:2x2x1
jax: 0.10.0
libtpu: 0.0.40
codegen_flags: <defaults>
</compile_context>

<pallas_src>
import math
from functools import partial

import jax
import jax.numpy as jnp
from jax import lax
from jax.experimental import pallas as pl
from jax.experimental.pallas import tpu as pltpu

# Full-precision f32 MXU passes in both kernel and reference so the parity check can
# be tight (1e-4) without any approx-op escape hatch.
MM_PRECISION = lax.Precision.HIGHEST


def _make_kernel(B, SQ, SK, D, H, DH):
    AH = H * DH
    BQ = B * SQ          # query rows in the fused projection
    BK = B * SK          # key/value rows

    def kernel(h_ref, c_ref, mask_ref, w_ref, b_ref, out_ref, scores_ref):
        """Whole batch in one invocation (everything resident in VMEM).

        h_ref:      (B, SQ, D)      hidden_states
        c_ref:      (B, SK, D)      context          (ctx_dim == hidden_size)
        mask_ref:   (B, SQ, SK)     additive attention mask (head dim pre-squeezed)
        w_ref:      (D, 3*AH)       fused [wq/sqrt(DH) | wk | wv]
        b_ref:      (1, 3*AH)       fused [bq/sqrt(DH) | bk | bv]
        out_ref:    (B, SQ, AH)     context_layer
        scores_ref: (B, H, SQ, SK)  attention_scores (post-mask, pre-softmax)
        """
        # ---- one fused projection: rows = [hidden ; context], cols = [Q | K | V] ----
        x = jnp.concatenate(
            [h_ref[...].reshape(BQ, D), c_ref[...].reshape(BK, D)], axis=0)
        y = jnp.dot(x, w_ref[...], preferred_element_type=jnp.float32,
                    precision=MM_PRECISION) + b_ref[...]           # (BQ+BK, 3*AH)
        # Cross products (K/V of hidden rows, Q of context rows) ride along for free
        # inside the single MXU tile and are simply sliced away below.

        def heads_to_batch(t2d, s):
            # (rows, AH) -> (B*H, s, DH): one relayout moving heads to a leading batch
            # axis, so both attention matmuls use a single fused batch dim.
            return t2d.reshape(B, s, H, DH).transpose(0, 2, 1, 3).reshape(B * H, s, DH)

        qh = heads_to_batch(y[:BQ, :AH], SQ)            # scale already folded into W
        kh = heads_to_batch(y[BQ:, AH:2 * AH], SK)
        vh = heads_to_batch(y[BQ:, 2 * AH:], SK)

        # ---- scores: one batched matmul for all (batch, head) pairs ----
        s = jnp.einsum("bqd,bkd->bqk", qh, kh,
                       preferred_element_type=jnp.float32,
                       precision=MM_PRECISION)                      # (B*H, SQ, SK)
        s = s.reshape(B, H, SQ, SK) + mask_ref[...][:, None, :, :]
        scores_ref[...] = s

        # ---- one softmax over the whole tensor (exact divide for parity) ----
        m = jnp.max(s, axis=-1, keepdims=True)
        e = jnp.exp(s - m)
        p = e / jnp.sum(e, axis=-1, keepdims=True)
        # TODO(synk): dropout on attention_probs omitted (inference-mode identity).

        # ---- context: one batched matmul, then heads back onto the lane axis ----
        ctx = jnp.einsum("bqk,bkd->bqd", p.reshape(B * H, SQ, SK), vh,
                         preferred_element_type=jnp.float32,
                         precision=MM_PRECISION)                    # (B*H, SQ, DH)
        out_ref[...] = (ctx.reshape(B, H, SQ, DH)
                        .transpose(0, 2, 1, 3)
                        .reshape(B, SQ, AH))

    return kernel


def prepare_params(params, num_heads):
    """One-time parameter fusion (do NOT call per step).

    Folds the 1/sqrt(head_size) score scale into the query weight/bias and
    concatenates [wq_scaled | wk | wv] into a single (D, 3*AH) weight and (1, 3*AH)
    bias so the per-call path contains no concat/scale XLA ops."""
    wq, bq, wk, bk, wv, bv = params
    D, AH = wq.shape
    assert AH % num_heads == 0, "hidden size must be a multiple of num heads"
    assert wk.shape[0] == D and wv.shape[0] == D, (
        "fused projection path requires ctx_dim == hidden_size")
    scale = 1.0 / math.sqrt(AH // num_heads)
    w_fused = jnp.concatenate([wq * scale, wk, wv], axis=1)    # (D, 3*AH)
    b_fused = jnp.concatenate([bq * scale, bk, bv], axis=1)    # (1, 3*AH)
    return w_fused, b_fused


@partial(jax.jit, static_argnames=("num_heads",))
def bert_out_attention(hidden_states, context, attention_mask, w_fused, b_fused,
                       *, num_heads):
    """Returns (context_layer [B,SQ,AH], attention_scores [B,H,SQ,SK])."""
    B, SQ, D = hidden_states.shape
    _, SK, CTX_D = context.shape
    AH = w_fused.shape[1] // 3
    H = num_heads
    DH = AH // H
    assert D == CTX_D == w_fused.shape[0]

    # Squeeze the broadcast head dim out of the mask (no in-kernel reshape needed).
    mask3 = attention_mask.reshape(B, SQ, SK)

    vmem = lambda: pl.BlockSpec(memory_space=pltpu.MemorySpace.VMEM)
    return pl.pallas_call(
        _make_kernel(B, SQ, SK, D, H, DH),
        out_shape=(
            jax.ShapeDtypeStruct((B, SQ, AH), jnp.float32),
            jax.ShapeDtypeStruct((B, H, SQ, SK), jnp.float32),
        ),
        # No grid: one invocation, full arrays resident in VMEM (< 50 KB live data).
        in_specs=[vmem() for _ in range(5)],
        out_specs=(vmem(), vmem()),
    )(hidden_states, context, mask3, w_fused, b_fused)


def reference(hidden_states, context, attention_mask, params, num_heads):
    """Pure-JAX reference mirroring the PyTorch forward."""
    wq, bq, wk, bk, wv, bv = params
    B, SQ, D = hidden_states.shape
    _, SK, _ = context.shape
    AH = wq.shape[1]
    DH = AH // num_heads

    q = jnp.dot(hidden_states, wq, precision=MM_PRECISION) + bq   # (B, SQ, AH)
    k = jnp.dot(context, wk, precision=MM_PRECISION) + bk         # (B, SK, AH)
    v = jnp.dot(context, wv, precision=MM_PRECISION) + bv

    def split(x, s):
        return x.reshape(B, s, num_heads, DH).transpose(0, 2, 1, 3)   # (B,H,s,DH)

    qh, kh, vh = split(q, SQ), split(k, SK), split(v, SK)
    scores = jnp.einsum("bhqd,bhkd->bhqk", qh, kh,
                        precision=MM_PRECISION) / math.sqrt(DH)
    scores = scores + attention_mask
    probs = jax.nn.softmax(scores, axis=-1)
    ctx = jnp.einsum("bhqk,bhkd->bhqd", probs, vh, precision=MM_PRECISION)
    ctx = ctx.transpose(0, 2, 1, 3).reshape(B, SQ, AH)
    return ctx, scores


if __name__ == "__main__":
    B, SQ, SK, D, H = 2, 8, 8, 32, 4      # hidden=32, heads=4 -> head_size=8
    AH = D                                 # all_head_size == hidden_size

    key = jax.random.PRNGKey(0)
    k_h, k_c, k_m, k_q, k_k, k_v = jax.random.split(key, 6)

    hidden_states = jax.random.normal(k_h, (B, SQ, D), dtype=jnp.float32)
    context = jax.random.normal(k_c, (B, SK, D), dtype=jnp.float32)
    # BERT-style additive mask: 0 = keep, -10000 = masked; shape (B, 1, SQ, SK).
    keep = (jax.random.uniform(k_m, (B, 1, SQ, SK)) > 0.1).astype(jnp.float32)
    attention_mask = (1.0 - keep) * -10000.0

    def linear_init(k, fan_in, fan_out):
        kw, kb = jax.random.split(k)
        bound = 1.0 / math.sqrt(fan_in)
        w = jax.random.uniform(kw, (fan_in, fan_out), minval=-bound, maxval=bound,
                               dtype=jnp.float32)
        b = jax.random.uniform(kb, (1, fan_out), minval=-bound, maxval=bound,
                               dtype=jnp.float32)
        return w, b

    wq, bq = linear_init(k_q, D, AH)
    wk, bk = linear_init(k_k, D, AH)
    wv, bv = linear_init(k_v, D, AH)
    params = (wq, bq, wk, bk, wv, bv)

    # One-time parameter fusion (review item 1) -- NOT part of the per-call path.
    w_fused, b_fused = prepare_params(params, num_heads=H)

    ctx_out, scores_out = bert_out_attention(hidden_states, context, attention_mask,
                                             w_fused, b_fused, num_heads=H)
    jax.block_until_ready((ctx_out, scores_out))

    ctx_exp, scores_exp = reference(hidden_states, context, attention_mask, params, H)

    assert ctx_out.shape == (B, SQ, AH) and scores_out.shape == (B, H, SQ, SK)
    # Exact-path softmax + HIGHEST-precision matmuls on both sides: tight tolerance.
    assert jnp.allclose(scores_out, scores_exp, atol=1e-4, rtol=1e-4)
    assert jnp.allclose(ctx_out, ctx_exp, atol=1e-4, rtol=1e-4)

    print("KERNEL_OK")
</pallas_src>

<mosaic_0001>
module attributes {stable_mosaic.version = 11 : i64} {
  func.func @kernel(%arg0: memref<2x8x32xf32, #tpu.memory_space<vmem>>, %arg1: memref<2x8x32xf32, #tpu.memory_space<vmem>>, %arg2: memref<2x8x8xf32, #tpu.memory_space<vmem>>, %arg3: memref<32x96xf32, #tpu.memory_space<vmem>>, %arg4: memref<1x96xf32, #tpu.memory_space<vmem>>, %arg5: memref<2x8x32xf32, #tpu.memory_space<vmem>>, %arg6: memref<2x4x8x8xf32, #tpu.memory_space<vmem>>) attributes {dimension_semantics = [], scalar_prefetch = 0 : i64, scratch_operands = 0 : i64, tpu.core_type = #tpu.core_type<tc>} {
    %c0 = arith.constant 0 : index
    %c0_0 = arith.constant 0 : index
    %c0_1 = arith.constant 0 : index
    %0 = vector.load %arg0[%c0, %c0_0, %c0_1] : memref<2x8x32xf32, #tpu.memory_space<vmem>>, vector<2x8x32xf32>
    %1 = vector.shape_cast %0 : vector<2x8x32xf32> to vector<16x32xf32>
    %c0_2 = arith.constant 0 : index
    %c0_3 = arith.constant 0 : index
    %c0_4 = arith.constant 0 : index
    %2 = vector.load %arg1[%c0_2, %c0_3, %c0_4] : memref<2x8x32xf32, #tpu.memory_space<vmem>>, vector<2x8x32xf32>
    %3 = vector.shape_cast %2 : vector<2x8x32xf32> to vector<16x32xf32>
    %4 = tpu.concatenate %1, %3 in 0 : vector<16x32xf32>, vector<16x32xf32> -> vector<32x32xf32>
    %c0_5 = arith.constant 0 : index
    %c0_6 = arith.constant 0 : index
    %5 = vector.load %arg3[%c0_5, %c0_6] : memref<32x96xf32, #tpu.memory_space<vmem>>, vector<32x96xf32>
    %cst = arith.constant dense<0.000000e+00> : vector<32x96xf32>
    %6 = tpu.matmul %4, %5, %cst {dimension_numbers = #tpu.dot_dimension_numbers<[1], [0], [0], [1], [0, 0, 1, 1], [], []>, precision = #tpu.contract_precision<fp32>} : vector<32x32xf32>, vector<32x96xf32>, vector<32x96xf32> -> vector<32x96xf32>
    %c0_7 = arith.constant 0 : index
    %c0_8 = arith.constant 0 : index
    %7 = vector.load %arg4[%c0_7, %c0_8] : memref<1x96xf32, #tpu.memory_space<vmem>>, vector<1x96xf32>
    %8 = vector.broadcast %7 : vector<1x96xf32> to vector<32x96xf32>
    %9 = arith.addf %6, %8 : vector<32x96xf32>
    %10 = vector.extract_strided_slice %9 {offsets = [0, 0], sizes = [16, 32], strides = [1, 1]} : vector<32x96xf32> to vector<16x32xf32>
    %11 = vector.shape_cast %10 : vector<16x32xf32> to vector<2x8x4x8xf32>
    %12 = tpu.transpose %11, [0, 2, 1, 3] : vector<2x8x4x8xf32> -> vector<2x4x8x8xf32>
    %13 = vector.shape_cast %12 : vector<2x4x8x8xf32> to vector<8x8x8xf32>
    %14 = vector.extract_strided_slice %9 {offsets = [16, 32], sizes = [16, 32], strides = [1, 1]} : vector<32x96xf32> to vector<16x32xf32>
    %15 = vector.shape_cast %14 : vector<16x32xf32> to vector<2x8x4x8xf32>
    %16 = tpu.transpose %15, [0, 2, 1, 3] : vector<2x8x4x8xf32> -> vector<2x4x8x8xf32>
    %17 = vector.shape_cast %16 : vector<2x4x8x8xf32> to vector<8x8x8xf32>
    %18 = vector.extract_strided_slice %9 {offsets = [16, 64], sizes = [16, 32], strides = [1, 1]} : vector<32x96xf32> to vector<16x32xf32>
    %19 = vector.shape_cast %18 : vector<16x32xf32> to vector<2x8x4x8xf32>
    %20 = tpu.transpose %19, [0, 2, 1, 3] : vector<2x8x4x8xf32> -> vector<2x4x8x8xf32>
    %21 = vector.shape_cast %20 : vector<2x4x8x8xf32> to vector<8x8x8xf32>
    "tpu.trace_start"() <{level = 10 : i32, message = "bqd,bkd->bqk"}> : () -> ()
    %cst_9 = arith.constant dense<0.000000e+00> : vector<8x8x8xf32>
    %22 = tpu.matmul %13, %17, %cst_9 {dimension_numbers = #tpu.dot_dimension_numbers<[2], [2], [1], [1], [0, 0, 0, 1, 1, 1], [0], [0]>, precision = #tpu.contract_precision<fp32>} : vector<8x8x8xf32>, vector<8x8x8xf32>, vector<8x8x8xf32> -> vector<8x8x8xf32>
    "tpu.trace_stop"() : () -> ()
    %23 = vector.shape_cast %22 : vector<8x8x8xf32> to vector<2x4x8x8xf32>
    %c0_10 = arith.constant 0 : index
    %c0_11 = arith.constant 0 : index
    %c0_12 = arith.constant 0 : index
    %24 = vector.load %arg2[%c0_10, %c0_11, %c0_12] : memref<2x8x8xf32, #tpu.memory_space<vmem>>, vector<2x8x8xf32>
    %25 = vector.shape_cast %24 : vector<2x8x8xf32> to vector<2x1x8x8xf32>
    %26 = vector.broadcast %25 : vector<2x1x8x8xf32> to vector<2x4x8x8xf32>
    %27 = arith.addf %23, %26 : vector<2x4x8x8xf32>
    %c0_13 = arith.constant 0 : index
    %c0_14 = arith.constant 0 : index
    %c0_15 = arith.constant 0 : index
    %c0_16 = arith.constant 0 : index
    %28 = vector.load %arg6[%c0_13, %c0_14, %c0_15, %c0_16] : memref<2x4x8x8xf32, #tpu.memory_space<vmem>>, vector<2x4x8x8xf32>
    tpu.vector_store %arg6[%c0_13, %c0_14, %c0_15, %c0_16], %27 {strides = array<i32>} : memref<2x4x8x8xf32, #tpu.memory_space<vmem>>, vector<2x4x8x8xf32>,
    %cst_17 = arith.constant dense<0xFF800000> : vector<2x4x8xf32>
    %29 = vector.multi_reduction <maximumf>, %27, %cst_17 [3] : vector<2x4x8x8xf32> to vector<2x4x8xf32>
    %30 = vector.shape_cast %29 : vector<2x4x8xf32> to vector<2x4x8x1xf32>
    %31 = vector.broadcast %30 : vector<2x4x8x1xf32> to vector<2x4x8x8xf32>
    %32 = arith.subf %27, %31 : vector<2x4x8x8xf32>
    %33 = math.exp %32 : vector<2x4x8x8xf32>
    %cst_18 = arith.constant dense<0.000000e+00> : vector<2x4x8xf32>
    %34 = vector.multi_reduction <add>, %33, %cst_18 [3] : vector<2x4x8x8xf32> to vector<2x4x8xf32>
    %35 = vector.shape_cast %34 : vector<2x4x8xf32> to vector<2x4x8x1xf32>
    %36 = vector.broadcast %35 : vector<2x4x8x1xf32> to vector<2x4x8x8xf32>
    %37 = arith.divf %33, %36 : vector<2x4x8x8xf32>
    %38 = vector.shape_cast %37 : vector<2x4x8x8xf32> to vector<8x8x8xf32>
    "tpu.trace_start"() <{level = 10 : i32, message = "bqk,bkd->bqd"}> : () -> ()
    %cst_19 = arith.constant dense<0.000000e+00> : vector<8x8x8xf32>
    %39 = tpu.matmul %38, %21, %cst_19 {dimension_numbers = #tpu.dot_dimension_numbers<[2], [1], [1], [2], [0, 0, 0, 1, 1, 2], [0], [0]>, precision = #tpu.contract_precision<fp32>} : vector<8x8x8xf32>, vector<8x8x8xf32>, vector<8x8x8xf32> -> vector<8x8x8xf32>
    "tpu.trace_stop"() : () -> ()
    %40 = vector.shape_cast %39 : vector<8x8x8xf32> to vector<2x4x8x8xf32>
    %41 = tpu.transpose %40, [0, 2, 1, 3] : vector<2x4x8x8xf32> -> vector<2x8x4x8xf32>
    %42 = vector.shape_cast %41 : vector<2x8x4x8xf32> to vector<2x8x32xf32>
    %c0_20 = arith.constant 0 : index
    %c0_21 = arith.constant 0 : index
    %c0_22 = arith.constant 0 : index
    %43 = vector.load %arg5[%c0_20, %c0_21, %c0_22] : memref<2x8x32xf32, #tpu.memory_space<vmem>>, vector<2x8x32xf32>
    tpu.vector_store %arg5[%c0_20, %c0_21, %c0_22], %42 {strides = array<i32>} : memref<2x8x32xf32, #tpu.memory_space<vmem>>, vector<2x8x32xf32>,
    return
  }
}

</mosaic_0001>

<bundles_post_ra>
// kernel: bert_out_attention.1
= control target key start
LH: loop header
LB: loop body
LE: loop exit
PB: predicated region body
PF: predicated region fallthrough
CT: control target
= control target key end

     0   :  { %12 = vsyncpa [#allocation3], 0  ;;  %s11463_s0 = inlined_call_operand.hbm [shape: f32[2,8,32], index: 0, kind: input, shape index: {}]   ;;  %s11464_s1 = inlined_call_operand.hbm [shape: f32[2,8,32], index: 1, kind: input, shape index: {}]   ;;  %s11465_s2 = inlined_call_operand.hbm [shape: f32[2,8,8], index: 2, kind: input, shape index: {}]   ;;  %s11466_s3 = inlined_call_operand.hbm [shape: f32[32,96], index: 3, kind: input, shape index: {}]   ;;  %s11467_s4 = inlined_call_operand.vmem [shape: f32[1,96], index: 4, kind: input, shape index: {}]   ;;  %s11468_s5 = inlined_call_operand.hbm [shape: f32[2,8,32], index: 5, kind: output, shape index: {0}]   ;;  %s11469_s6 = inlined_call_operand.hbm [shape: f32[2,4,8,8], index: 6, kind: output, shape index: {1}]  }
   0x1   :  { %13 = vsyncpa [#allocation6], 0 }
   0x2   :  { %14 = vsyncpa [#allocation9], 0 }
   0x3   :  { %15 = vsyncpa [#allocation4], 0 }
   0x4   :  { %16 = vsyncpa [#allocation12], 0  ;;  %s10277_s21 = smov [#allocation5]   ;;  %s10278_s23 = smov [#allocation2]  }
   0x5   :  { %s34_s22 = sshll.u32 %s10277_s21, 4  ;;  %s22_s24 = sshll.u32 %s10278_s23, 4  ;;  %s35_s22 = int_to_ptr.vmem [resolvable:$true] %s34_s22  ;;  %s23_s24 = int_to_ptr.vmem [resolvable:$true] %s22_s24 }
   0x6   :  { %s10155_s25 = scalar_lea.vmem %s35_s22, 256  ;;  %p10160_p1 = scmp.lt.s32.totalorder %s35_s22, %s35_s22 }
   0x7   :  { %p10156_p0 = scmp.ne.s32.totalorder %s35_s22, %s10155_s25  ;;  %p10161_p2 = scmp.lt.s32.totalorder %s10155_s25, %s10155_s25 }
   0x9   :  { %p10162_p3 = por %p10161_p2, %p10160_p1 }
   0xb   :  { %p10163_p4 = pnand %p10162_p3, %p10156_p0 }
   0xd   :  { %10166 = shalt.err (!%p10163_p4)
}
   0xe   :  { %s10279_s26 = smov 128   ;;  %s10280_s27 = smov 8  }
   0xf   :  { %40 = dma.hbm_to_vmem [thread:$0]  %s11464_s1, 256, %s35_s22, [#allocation6], %s10279_s26, %s10279_s26, %s10280_s27  }
  0x10   :  { %s10175_s30 = scalar_lea.vmem %s23_s24, 256  ;;  %p10180_p6 = scmp.lt.s32.totalorder %s23_s24, %s23_s24 }
  0x11   :  { %p10176_p5 = scmp.ne.s32.totalorder %s23_s24, %s10175_s30  ;;  %p10181_p7 = scmp.lt.s32.totalorder %s10175_s30, %s10175_s30 }
  0x13   :  { %p10182_p8 = por %p10181_p7, %p10180_p6 }
  0x15   :  { %p10183_p9 = pnand %p10182_p8, %p10176_p5 }
  0x17   :  { %10186 = shalt.err (!%p10183_p9)
}
  0x18   :  { %28 = dma.hbm_to_vmem [thread:$0]  %s11463_s0, 256, %s23_s24, [#allocation3], %s10279_s26, %s10279_s26, %s10280_s27  }
  0x19   :  { %s10281_s9 = smov [#allocation7]   ;;  %s10282_s11 = smov [#allocation8]  }
  0x1a   :  { %s46_s10 = sshll.u32 %s10281_s9, 4  ;;  %s58_s12 = sshll.u32 %s10282_s11, 4  ;;  %s47_s10 = int_to_ptr.vmem [resolvable:$true] %s46_s10  ;;  %s59_s12 = int_to_ptr.vmem [resolvable:$true] %s58_s12 }
  0x1b   :  { %s10195_s1 = scalar_lea.vmem %s47_s10, 256  ;;  %p10200_p11 = scmp.lt.s32.totalorder %s47_s10, %s47_s10 }
  0x1c   :  { %p10196_p10 = scmp.ne.s32.totalorder %s47_s10, %s10195_s1  ;;  %p10201_p12 = scmp.lt.s32.totalorder %s10195_s1, %s10195_s1 }
  0x1e   :  { %p10202_p13 = por %p10201_p12, %p10200_p11 }
  0x20   :  { %p10203_p0 = pnand %p10202_p13, %p10196_p10 }
  0x22   :  { %10206 = shalt.err (!%p10203_p0)
}
  0x23   :  { %52 = dma.hbm_to_vmem [thread:$0]  %s11465_s2, 256, %s47_s10, [#allocation6], %s10279_s26, %s10279_s26, %s10280_s27  }
  0x24   :  { %s10215_s0 = scalar_lea.vmem %s59_s12, 512  ;;  %p10220_p2 = scmp.lt.s32.totalorder %s59_s12, %s59_s12 }
  0x25   :  { %p10216_p1 = scmp.ne.s32.totalorder %s59_s12, %s10215_s0  ;;  %p10221_p3 = scmp.lt.s32.totalorder %s10215_s0, %s10215_s0 }
  0x27   :  { %p10222_p4 = por %p10221_p3, %p10220_p2 }
  0x29   :  { %p10223_p5 = pnand %p10222_p4, %p10216_p1 }
  0x2b   :  { %10226 = shalt.err (!%p10223_p5)
}
  0x2c   :  { %64 = dma.hbm_to_vmem [thread:$0]  %s11466_s3, 512, %s59_s12, [#allocation9], %s10279_s26, %s10279_s26, %s10280_s27  }
  0x2d   :  { %10267 = dma.done.wait [#allocation3], 256  }
  0x2e   :  { %10268 = vsyncadd [#allocation3], 4294967040 }
  0x2f   :  { %10269 = dma.done.wait [#allocation6], 512  }
  0x30   :  { %10270 = vsyncadd [#allocation6], 4294966784 }
  0x31   :  { %10271 = dma.done.wait [#allocation9], 512  }
  0x32   :  { %10272 = vsyncadd [#allocation9], 4294966784  ;;  %vm94_vm0 = vcmask 261120   ;;  %v86_v0 = vld [vmem:[#allocation8 + $0x18] sm:$0xff]  ;;  %v85_v1 = vld [vmem:[#allocation8 + $0x10] sm:$0xff]  ;;  %s10284_s17 = smov 120  }
  0x33   :  { %v84_v2 = vld [vmem:[#allocation8 + $0x8] sm:$0xff]  ;;  %v10355_v3 = vand.u32 4294901760, %v86_v0  ;;  %v10357_v4 = vand.u32 4294901760, %v85_v1  ;;  %v83_v6 = vld [vmem:[#allocation8] sm:$0xff]  ;;  %v79_v7 = vld [vmem:[#allocation2] sm:$0xff]  ;;  %s10285_s18 = smov 112  }
  0x34   :  { %v10359_v5 = vand.u32 4294901760, %v84_v2  ;;  %v80_v8 = vld [vmem:[#allocation2 + $0x8] sm:$0xff]  ;;  %v10361_v9 = vand.u32 4294901760, %v83_v6  ;;  %v96_v10 = vsel %vm94_vm0, %v79_v7, 0  ;;  %v81_v12 = vld [vmem:[#allocation5] sm:$0xff]  ;;  %v82_v13 = vld [vmem:[#allocation5 + $0x8] sm:$0xff] }
  0x35   :  { %v99_v11 = vsel %vm94_vm0, %v80_v8, 0  ;;  %9532 = vmatprep.subr.mxu0 %v10355_v3  ;;  %v242_v14 = vsub.f32 %v86_v0, %v10355_v3  ;;  %v10367_v15 = vand.u32 4294901760, %v96_v10  ;;  %v249_v17 = vsub.f32 %v85_v1, %v10357_v4  ;;  %v9275_v52 = vld [vmem:[%s11467_s4] ss:$0 sm:$0xff]  ;;  %s10283_s4 = smov 104   ;;  %s10286_s19 = smov 96  }
  0x36   :  { %v10369_v16 = vand.u32 4294901760, %v99_v11  ;;  %9533 = vmatpush3.msra.mxu0 %v10355_v3  ;;  %v256_v18 = vsub.f32 %v84_v2, %v10359_v5  ;;  %v102_v19 = vsel %vm94_vm0, %v81_v12, 0  ;;  %v105_v20 = vsel %vm94_vm0, %v82_v13, 0  ;;  %s10288_s20 = smov 64   ;;  %s10292_s21 = smov 16  }
  0x37   :  { %v263_v21 = vsub.f32 %v83_v6, %v10361_v9  ;;  %9534 = vmatprep.subr.mxu0 %v10357_v4  ;;  %v10378_v22 = vand.u32 4294901760, %v242_v14  ;;  %v10381_v23 = vsub.f32 %v96_v10, %v10367_v15  ;;  %v10386_v25 = vand.u32 4294901760, %v249_v17  ;;  %9554 = vmatprep.mubr.f32.mxu1 %v10367_v15  ;;  %s10293_s22 = smov [#allocation11]  }
  0x38   :  { %v10384_v24 = vsub.f32 %v99_v11, %v10369_v16  ;;  %9535 = vmatpush3.msra.mxu0 %v10357_v4  ;;  %v10390_v26 = vand.u32 4294901760, %v256_v18  ;;  %v10392_v27 = vand.u32 4294901760, %v102_v19  ;;  %v10394_v28 = vand.u32 4294901760, %v105_v20  ;;  %s9257_s23 = sshll.u32 %s10293_s22, 4  ;;  %s9258_s23 = int_to_ptr.vmem [resolvable:$true] %s9257_s23 }
  0x39   :  { %v10396_v29 = vand.u32 4294901760, %v263_v21  ;;  %9536 = vmatprep.subr.mxu0 %v10359_v5  ;;  %v244_v30 = vsub.f32 %v242_v14, %v10378_v22  ;;  %v178_v31 = vand.u32 4294901760, %v10381_v23  ;;  %v251_v33 = vsub.f32 %v249_v17, %v10386_v25  ;;  %s10227_s24 = scalar_lea.vmem %s9258_s23, 1024  ;;  %p10232_p7 = scmp.lt.s32.totalorder %s9258_s23, %s9258_s23 }
  0x3a   :  { %v188_v32 = vand.u32 4294901760, %v10384_v24  ;;  %9537 = vmatpush3.msra.mxu0 %v10359_v5  ;;  %v258_v34 = vsub.f32 %v256_v18, %v10390_v26  ;;  %v10406_v35 = vsub.f32 %v102_v19, %v10392_v27  ;;  %v10409_v36 = vsub.f32 %v105_v20, %v10394_v28  ;;  %p10228_p6 = scmp.ne.s32.totalorder %s9258_s23, %s10227_s24  ;;  %p10233_p8 = scmp.lt.s32.totalorder %s10227_s24, %s10227_s24 }
  0x3b   :  { %9538 = vmatprep.subr.mxu0 %v10361_v9  ;;  %v245_v37 = vand.u32 4294901760, %v244_v30  ;;  %v179_v38 = vsub.f32 %v10381_v23, %v178_v31  ;;  %v252_v40 = vand.u32 4294901760, %v251_v33  ;;  %v265_v43 = vsub.f32 %v263_v21, %v10396_v29 }
  0x3c   :  { %v189_v39 = vsub.f32 %v10384_v24, %v188_v32  ;;  %9539 = vmatpush3.msra.mxu0 %v10361_v9  ;;  %v198_v41 = vand.u32 4294901760, %v10406_v35  ;;  %v208_v42 = vand.u32 4294901760, %v10409_v36  ;;  %v259_v46 = vand.u32 4294901760, %v258_v34  ;;  %p10234_p9 = por %p10233_p8, %p10232_p7 }
  0x3d   :  { %9546 = vmatprep.subr.mxu1 %v245_v37  ;;  %v180_v44 = vand.u32 4294901760, %v179_v38  ;;  %9560 = vmatprep.subr.mxu0 %v242_v14  ;;  %v266_v51 = vand.u32 4294901760, %v265_v43  ;;  %vm10289_vm1 = vmmov 0   ;;  %vm1619_vm2 = vcmask 64512  }
  0x3e   :  { %v190_v45 = vand.u32 4294901760, %v189_v39  ;;  %9547 = vmatpush3.msra.mxu1 %v245_v37  ;;  %v199_v47 = vsub.f32 %v10406_v35, %v198_v41  ;;  %v209_v48 = vsub.f32 %v10409_v36, %v208_v42  ;;  %p10235_p10 = pnand %p10234_p9, %p10228_p6 }
  0x3f   :  { %9540 = vmatprep.mubr.f32.mxu0 %v180_v44  ;;  %9548 = vmatprep.subr.mxu1 %v252_v40 }
  0x40   :  { %9541 = vmatmul.mubr.f32.vlgmr.msra.gmra.mxu0 %v190_v45  ;;  %9549 = vmatpush3.msra.mxu1 %v252_v40  ;;  %v200_v49 = vand.u32 4294901760, %v199_v47  ;;  %v210_v50 = vand.u32 4294901760, %v209_v48  ;;  %v10290_v45 = vmov 1983009808   ;;  %v746_v47 = vlaneseq }
  0x41   :  { %9561 = vmatpush3.msra.mxu0 %v242_v14  ;;  %9550 = vmatprep.subr.mxu1 %v259_v46  ;;  %v10291_v48 = vmov 1934713408  }
  0x42   :  { %9562 = vmatprep.subr.mxu0 %v249_v17  ;;  %9543 = vmatprep.mubr.f32.mxu0 %v200_v49  ;;  %v776_v49 = vunpack.c.l.s4 %v10291_v48 }
  0x43   :  { %9551 = vmatpush3.msra.mxu1 %v259_v46  ;;  %9563 = vmatpush3.msra.mxu0 %v249_v17  ;;  %v744_v46 = vunpack.c.l.s4 %v10290_v45 }
  0x44   :  { %9544 = vmatmul.mubr.f32.gmra.mxu0 %v210_v50  ;;  %9552 = vmatprep.subr.mxu1 %v266_v51 }
  0x45   :  { %9564 = vmatprep.subr.mxu0 %v256_v18  ;;  %9553 = vmatpush3.msra.mxu1 %v266_v51  ;;  %v745_v50 = vunpack.c.0.s8 %v744_v46  ;;  %v747_v51 = vshrl.u32 %v746_v47, 7 }
  0x46   :  { %9565 = vmatpush3.msra.mxu0 %v256_v18  ;;  %9555 = vmatmul.mubr.f32.vlgmr.msra.gmra.mxu1 %v10369_v16 }
  0x47   :  { %9566 = vmatprep.subr.mxu0 %v263_v21  ;;  %9574 = vmatprep.subr.mxu1 %v10355_v3 }
  0x48   :  { %9567 = vmatpush3.msra.mxu0 %v263_v21  ;;  %9568 = vmatprep.mubr.f32.mxu0 %v10381_v23 }
  0x49   :  { %9575 = vmatpush3.msra.mxu1 %v10355_v3  ;;  %9569 = vmatmul.mubr.f32.vlgmr.msra.gmra.mxu0 %v10384_v24 }
  0x4a   :  { %9576 = vmatprep.subr.mxu1 %v10357_v4  ;;  %9588 = vmatprep.subr.mxu0 %v10378_v22 }
  0x4b   :  { %9557 = vmatprep.mubr.f32.mxu1 %v10392_v27  ;;  %9577 = vmatpush3.msra.mxu1 %v10357_v4 }
  0x4c   :  { %9589 = vmatpush3.msra.mxu0 %v10378_v22  ;;  %9558 = vmatmul.mubr.f32.gmra.mxu1 %v10394_v28 }
  0x4d   :  { %9578 = vmatprep.subr.mxu1 %v10359_v5  ;;  %9590 = vmatprep.subr.mxu0 %v10386_v25 }
  0x4e   :  { %9571 = vmatprep.mubr.f32.mxu0 %v10406_v35  ;;  %9579 = vmatpush3.msra.mxu1 %v10359_v5 }
  0x4f   :  { %9591 = vmatpush3.msra.mxu0 %v10386_v25  ;;  %9580 = vmatprep.subr.mxu1 %v10361_v9 }
  0x50   :  { %9572 = vmatmul.mubr.f32.gmra.mxu0 %v10409_v36  ;;  %9592 = vmatprep.subr.mxu0 %v10390_v26 }
  0x51   :  { %9581 = vmatpush3.msra.mxu1 %v10361_v9  ;;  %9582 = vmatprep.mubr.f32.mxu1 %v178_v31 }
  0x52   :  { %9593 = vmatpush3.msra.mxu0 %v10390_v26  ;;  %9583 = vmatmul.mubr.f32.vlgmr.msra.gmra.mxu1 %v188_v32 }
  0x53   :  { %9594 = vmatprep.subr.mxu0 %v10396_v29  ;;  %9602 = vmatprep.subr.mxu1 %v10355_v3 }
  0x54   :  { %9595 = vmatpush3.msra.mxu0 %v10396_v29  ;;  %9596 = vmatprep.mubr.f32.mxu0 %v10367_v15 }
  0x55   :  { %9603 = vmatpush3.msra.mxu1 %v10355_v3  ;;  %9597 = vmatmul.mubr.f32.vlgmr.msra.gmra.mxu0 %v10369_v16 }
  0x56   :  { %9604 = vmatprep.subr.mxu1 %v10357_v4  ;;  %9585 = vmatprep.mubr.f32.mxu1 %v198_v41  ;;  %v10287_v41 = vmov 0.0  }
  0x57   :  { %9605 = vmatpush3.msra.mxu1 %v10357_v4  ;;  %9599 = vmatprep.mubr.f32.mxu0 %v10392_v27 }
  0x58   :  { %9586 = vmatmul.mubr.f32.gmra.mxu1 %v208_v42  ;;  %9606 = vmatprep.subr.mxu1 %v10359_v5 }
  0x59   :  { %9607 = vmatpush3.msra.mxu1 %v10359_v5  ;;  %9600 = vmatmul.mubr.f32.gmra.mxu0 %v10394_v28 }
  0x5a   :  { %9608 = vmatprep.subr.mxu1 %v10361_v9  ;;  %9610 = vmatprep.mubr.f32.mxu1 %v10367_v15 }
  0x5b   :  { %9609 = vmatpush3.msra.mxu1 %v10361_v9  ;;  %9616 = vmatprep.subr.mxu0 %v10287_v41 }
  0x5c   :  { %9611 = vmatmul.mubr.f32.vlgmr.msra.gmra.mxu1 %v10369_v16  ;;  %9621 = vmatprep.subr.mxu1 %v10287_v41 }
  0x5d   :  { %9613 = vmatprep.mubr.f32.mxu1 %v10392_v27  ;;  %9618 = vmatprep.mubr.msk.f32.mxu0 %vm10289_vm1, %v10287_v41 }
  0x60   :  { %9614 = vmatmul.mubr.f32.gmra.mxu1 %v10394_v28 }
  0x61   :  { %9623 = vmatprep.mubr.msk.f32.mxu1 %vm10289_vm1, %v10287_v41 }
 0x100   :  { %v9542_v53 = vpop.f32.mrf.mxu0 }
 0x101   :  { %v193_v54 = vadd.f32 %v9542_v53, %v9275_v52 }
 0x102   :  { %v182_v55 = vpop.f32.mrf.mxu0 }
 0x103   :  { %v183_v25 = vadd.f32 %v9275_v52, %v182_v55  ;;  %v10517_v55 = vsub.s32 %v745_v50, %v747_v51 }
 0x104   :  { %v9545_v56 = vpop.f32.mrf.mxu0 }
 0x105   :  { %v213_v10 = vadd.f32 %v9545_v56, %v9275_v52 }
 0x106   :  { %v202_v57 = vpop.f32.mrf.mxu0  ;;  %v9556_v58 = vpop.f32.mrf.mxu1 }
 0x107   :  { %v310_v59 = vadd.f32 %v9556_v58, %v193_v54  ;;  %v203_v7 = vadd.f32 %v9275_v52, %v202_v57  ;;  %v777_v54 = vunpack.c.0.s8 %v776_v49 }
 0x108   :  { %v303_v60 = vpop.f32.mrf.mxu1 }
 0x109   :  { %v9570_v61 = vpop.f32.mrf.mxu0  ;;  %v304_v29 = vadd.f32 %v303_v60, %v183_v25 }
 0x10a   :  { %v409_v62 = vadd.f32 %v9570_v61, %v310_v59 }
 0x10b   :  { %v401_v0 = vpop.f32.mrf.mxu0 }
 0x10c   :  { %v9559_v63 = vpop.f32.mrf.mxu1  ;;  %v402_v32 = vadd.f32 %v401_v0, %v304_v29 }
 0x10d   :  { %v322_v16 = vadd.f32 %v9559_v63, %v213_v10 }
 0x10e   :  { %v315_v1 = vpop.f32.mrf.mxu1 }
 0x10f   :  { %v316_v11 = vadd.f32 %v315_v1, %v203_v7 }
 0x110   :  { %v9573_v2 = vpop.f32.mrf.mxu0 }
 0x111   :  { %v423_v23 = vadd.f32 %v9573_v2, %v322_v16 }
 0x112   :  { %v415_v3 = vpop.f32.mrf.mxu0  ;;  %v9584_v4 = vpop.f32.mrf.mxu1 }
 0x113   :  { %v508_v5 = vadd.f32 %v9584_v4, %v409_v62  ;;  %v416_v17 = vadd.f32 %v415_v3, %v316_v11  ;;  %v10519_v62 = vsub.s32 %v777_v54, %v747_v51 }
 0x114   :  { %v499_v6 = vpop.f32.mrf.mxu1 }
 0x115   :  { %v9598_v8 = vpop.f32.mrf.mxu0  ;;  %v500_v34 = vadd.f32 %v499_v6, %v402_v32 }
 0x116   :  { %v613_v9 = vadd.f32 %v9598_v8, %v508_v5 }
 0x117   :  { %v606_v12 = vpop.f32.mrf.mxu0 }
 0x118   :  { %v9587_v13 = vpop.f32.mrf.mxu1  ;;  %v607_v35 = vadd.f32 %v606_v12, %v500_v34 }
 0x119   :  { %v9601_v15 = vpop.f32.mrf.mxu0  ;;  %v524_v26 = vadd.f32 %v9587_v13, %v423_v23 }
 0x11a   :  { %v515_v14 = vpop.f32.mrf.mxu1 }
 0x11b   :  { %v516_v19 = vadd.f32 %v515_v14, %v416_v17  ;;  %v618_v21 = vpop.f32.mrf.mxu0  ;;  %v625_v31 = vadd.f32 %v9601_v15, %v524_v26 }
 0x11c   :  { %v9612_v18 = vpop.f32.mrf.mxu1 }
 0x11d   :  { %v10470_v20 = vadd.f32 %v9612_v18, %v613_v9  ;;  %v619_v27 = vadd.f32 %v618_v21, %v516_v19 }
 0x11e   :  { %v699_v22 = vpop.f32.mrf.mxu1 }
 0x11f   :  { %v10481_v36 = vadd.f32 %v699_v22, %v607_v35 }
 0x120   :  { %v9615_v24 = vpop.f32.mrf.mxu1 }
 0x121   :  { %v10474_v33 = vadd.f32 %v9615_v24, %v625_v31 }
 0x122   :  { %v711_v28 = vpop.f32.mrf.mxu1 }
 0x123   :  { %v712_v30 = vadd.f32 %v711_v28, %v619_v27 }
 0x125   :  { %1023 = vrot.lane.b32.xlu1 %v712_v30, %s10283_s4  ;;  %1015 = vrot.lane.b32.xlu0 %v712_v30, %s10284_s17 }
 0x129   :  { %1017 = vrot.lane.b32.xlu1 %v10474_v33, %s10284_s17  ;;  %1019 = vrot.lane.b32.xlu0 %v712_v30, %s10285_s18 }
 0x12d   :  { %1025 = vrot.lane.b32.xlu1 %v10474_v33, %s10283_s4  ;;  %1021 = vrot.lane.b32.xlu0 %v10474_v33, %s10285_s18 }
 0x131   :  { %723 = vrot.lane.b32.xlu0 %v10481_v36, %s10284_s17 }
 0x135   :  { %1027 = vrot.lane.b32.xlu0 %v712_v30, %s10286_s19 }
 0x197   :  { %v1016_v37 = vpop.permute.xlu0 %1015  ;;  %v10485_v38 = vpop.permute.xlu1 %1023 }
 0x198   :  { %1031 = vrot.lane.b32.xlu1 %v1016_v37, %s10286_s19 }
 0x19b   :  { %v10487_v39 = vpop.permute.xlu0 %1019  ;;  %v10494_v40 = vpop.permute.xlu1 %1017 }
 0x19c   :  { %1039 = vrot.lane.b32.xlu1 %v10485_v38, %s10286_s19  ;;  %1035 = vrot.lane.b32.xlu0 %v10487_v39, %s10286_s19 }
 0x19f   :  { %v10500_v42 = vpop.permute.xlu1 %1025  ;;  %v10502_v43 = vpop.permute.xlu0 %1021 }
 0x1a0   :  { %729 = vrot.lane.b32.xlu1 %v10481_v36, %s10285_s18  ;;  %735 = vrot.lane.b32.xlu0 %v10481_v36, %s10283_s4 }
 0x1a3   :  { %v724_v44 = vpop.permute.xlu0 %723 }
 0x1a4   :  { %1029 = vrot.lane.b32.xlu1 %v10474_v33, %s10286_s19  ;;  %1033 = vrot.lane.b32.xlu0 %v10494_v40, %s10286_s19 }
 0x1a7   :  { %v1028_v52 = vpop.permute.xlu0 %1027 }
 0x1a8   :  { %1037 = vrot.lane.b32.xlu1 %v10502_v43, %s10286_s19  ;;  %1041 = vrot.lane.b32.xlu0 %v10500_v42, %s10286_s19 }
 0x1ac   :  { %725 = vrot.lane.b32.xlu1 %v10470_v20, %s10284_s17  ;;  %731 = vrot.lane.b32.xlu0 %v10470_v20, %s10285_s18 }
 0x1b0   :  { %737 = vrot.lane.b32.xlu1 %v10470_v20, %s10283_s4  ;;  %1323 = vrot.lane.b32.xlu0 %v712_v30, %s10288_s20 }
 0x1b4   :  { %1327 = vrot.lane.b32.xlu1 %v1016_v37, %s10288_s20 }
 0x20a   :  { %v1032_v53 = vpop.permute.xlu1 %1031 }
 0x20e   :  { %v1040_v56 = vpop.permute.xlu1 %1039  ;;  %v1036_v57 = vpop.permute.xlu0 %1035 }
 0x20f   :  { %v1067_v58 = vcombine.low %v1032_v53, %v1040_v56  ;;  %v1068_v59 = vcombine.high %v1032_v53, %v1040_v56  ;;  %v1051_v60 = vcombine.low %v1028_v52, %v1036_v57  ;;  %v1052_v61 = vcombine.high %v1028_v52, %v1036_v57 }
 0x211   :  { %v1075_v63 = vrot.slane %v1067_v58, %v10517_v55  ;;  %v1082_v0 = vrot.slane %v1068_v59, %v10517_v55  ;;  %v1059_v1 = vrot.slane %v1051_v60, %v10517_v55  ;;  %v1066_v2 = vrot.slane %v1052_v61, %v10517_v55 }
 0x212   :  { %v730_v3 = vpop.permute.xlu1 %729  ;;  %v736_v4 = vpop.permute.xlu0 %735 }
 0x213   :  { %v1083_v5 = vcombine.low %v1059_v1, %v1075_v63  ;;  %v1084_v6 = vcombine.high %v1059_v1, %v1075_v63  ;;  %v1099_v7 = vcombine.low %v1066_v2, %v1082_v0  ;;  %v1100_v8 = vcombine.high %v1066_v2, %v1082_v0 }
 0x214   :  { %v741_v9 = vcombine.low %v10481_v36, %v730_v3  ;;  %v742_v10 = vcombine.high %v10481_v36, %v730_v3  ;;  %v757_v11 = vcombine.low %v724_v44, %v736_v4  ;;  %v758_v12 = vcombine.high %v724_v44, %v736_v4 }
 0x215   :  { %v1091_v13 = vrot.slane %v1083_v5, %v10519_v62  ;;  %v1098_v14 = vrot.slane %v1084_v6, %v10519_v62  ;;  %v1107_v15 = vrot.slane %v1099_v7, %v10519_v62  ;;  %v1114_v16 = vrot.slane %v1100_v8, %v10519_v62 }
 0x216   :  { %v749_v17 = vrot.slane %v741_v9, %v10517_v55  ;;  %v756_v18 = vrot.slane %v742_v10, %v10517_v55  ;;  %v765_v19 = vrot.slane %v757_v11, %v10517_v55  ;;  %v772_v21 = vrot.slane %v758_v12, %v10517_v55  ;;  %v1030_v30 = vpop.permute.xlu1 %1029  ;;  %v1034_v56 = vpop.permute.xlu0 %1033 }
 0x217   :  { %v1187_v26 = vcombine.low %v1091_v13, %v1098_v14  ;;  %v9280_v27 = vcombine.high %v1091_v13, %v1098_v14  ;;  %v1203_v28 = vcombine.low %v1107_v15, %v1114_v16  ;;  %v9281_v29 = vcombine.high %v1107_v15, %v1114_v16 }
 0x218   :  { %v773_v22 = vcombine.low %v749_v17, %v765_v19  ;;  %v774_v23 = vcombine.high %v749_v17, %v765_v19  ;;  %v789_v24 = vcombine.low %v756_v18, %v772_v21  ;;  %v790_v25 = vcombine.high %v756_v18, %v772_v21 }
 0x219   :  { %v10540_v46 = vrot.slane %v1187_v26, %v10517_v55  ;;  %v1202_v47 = vrot.slane %v9280_v27, %v10517_v55  ;;  %v1210_v48 = vrot.slane %v1203_v28, %v10517_v55  ;;  %v1218_v49 = vrot.slane %v9281_v29, %v10517_v55 }
 0x21a   :  { %v781_v31 = vrot.slane %v773_v22, %v10519_v62  ;;  %v788_v32 = vrot.slane %v774_v23, %v10519_v62  ;;  %v797_v34 = vrot.slane %v789_v24, %v10519_v62  ;;  %v804_v35 = vrot.slane %v790_v25, %v10519_v62  ;;  %v1038_v54 = vpop.permute.xlu1 %1037  ;;  %v1042_v63 = vpop.permute.xlu0 %1041 }
 0x21b   :  { %v1219_v57 = vcombine.low %v10540_v46, %v1202_v47  ;;  %v1235_v58 = vcombine.low %v1210_v48, %v1218_v49  ;;  %v1119_v4 = vcombine.low %v1030_v30, %v1038_v54  ;;  %v1135_v5 = vcombine.low %v1034_v56, %v1042_v63 }
 0x21c   :  { %v877_v36 = vcombine.low %v781_v31, %v788_v32  ;;  %v9276_v37 = vcombine.high %v781_v31, %v788_v32  ;;  %v893_v44 = vcombine.low %v797_v34, %v804_v35  ;;  %v9277_v45 = vcombine.high %v797_v34, %v804_v35 }
 0x21d   :  { %v1227_v2 = vrot.slane %v1219_v57, %v10519_v62  ;;  %v1243_v3 = vrot.slane %v1235_v58, %v10519_v62  ;;  %v1120_v6 = vcombine.high %v1030_v30, %v1038_v54  ;;  %v1136_v10 = vcombine.high %v1034_v56, %v1042_v63 }
 0x21e   :  { %v10546_v50 = vrot.slane %v877_v36, %v10517_v55  ;;  %v892_v51 = vrot.slane %v9276_v37, %v10517_v55  ;;  %v900_v52 = vrot.slane %v893_v44, %v10517_v55  ;;  %v908_v53 = vrot.slane %v9277_v45, %v10517_v55  ;;  %v726_v61 = vpop.permute.xlu1 %725  ;;  %v732_v11 = vpop.permute.xlu0 %731 }
 0x21f   :  { %v1251_v8 = vcombine.low %v1227_v2, %v1243_v3  ;;  %v1252_v12 = vcombine.high %v1227_v2, %v1243_v3  ;;  %v1220_v13 = vcombine.high %v10540_v46, %v1202_v47  ;;  %v1236_v17 = vcombine.high %v1210_v48, %v1218_v49 }
 0x220   :  { %v909_v59 = vcombine.low %v10546_v50, %v892_v51  ;;  %v925_v60 = vcombine.low %v900_v52, %v908_v53  ;;  %v1127_v18 = vrot.slane %v1119_v4, %v10517_v55  ;;  %v1143_v19 = vrot.slane %v1135_v5, %v10517_v55 }
 0x221   :  { %v1624_v14 = vsel %vm1619_vm2, %v1251_v8, 0  ;;  %v1134_v22 = vrot.slane %v1120_v6, %v10517_v55  ;;  %v809_v23 = vcombine.low %v10470_v20, %v732_v11  ;;  %v910_v26 = vcombine.high %v10546_v50, %v892_v51 }
 0x222   :  { %v917_v0 = vrot.slane %v909_v59, %v10519_v62  ;;  %v933_v1 = vrot.slane %v925_v60, %v10519_v62  ;;  %v738_v7 = vpop.permute.xlu1 %737  ;;  %v10564_v24 = vand.u32 4294901760, %v1624_v14  ;;  %v1150_v27 = vrot.slane %v1136_v10, %v10517_v55 }
 0x223   :  { %v825_v21 = vcombine.low %v726_v61, %v738_v7  ;;  %v826_v28 = vcombine.high %v726_v61, %v738_v7  ;;  %v2076_v29 = vsel %vm1619_vm2, %v1252_v12, 0  ;;  %v926_v30 = vcombine.high %v900_v52, %v908_v53 }
 0x224   :  { %v941_v9 = vcombine.low %v917_v0, %v933_v1  ;;  %v942_v16 = vcombine.high %v917_v0, %v933_v1  ;;  %9617 = vmatpush3.xpose.msra.mxu0 %v10564_v24  ;;  %v1734_v31 = vsub.f32 %v1624_v14, %v10564_v24  ;;  %v1151_v35 = vcombine.low %v1127_v18, %v1143_v19 }
 0x225   :  { %v1152_v36 = vcombine.high %v1127_v18, %v1143_v19  ;;  %v810_v37 = vcombine.high %v10470_v20, %v732_v11  ;;  %v833_v44 = vrot.slane %v825_v21, %v10517_v55  ;;  %9626 = vmatprep.subr.mxu0 %v10287_v41  ;;  %v817_v45 = vrot.slane %v809_v23, %v10517_v55 }
 0x226   :  { %v1621_v15 = vsel %vm1619_vm2, %v941_v9, 0  ;;  %v2073_v34 = vsel %vm1619_vm2, %v942_v16, 0  ;;  %v1735_v46 = vand.u32 4294901760, %v1734_v31  ;;  %v10582_v48 = vand.u32 4294901760, %v2076_v29 }
 0x227   :  { %v10566_v25 = vand.u32 4294901760, %v1621_v15  ;;  %v840_v49 = vrot.slane %v826_v28, %v10517_v55  ;;  %v10585_v50 = vand.u32 4294901760, %v2073_v34  ;;  %v10588_v51 = vrot.slane %v1220_v13, %v10519_v62 }
 0x228   :  { %v10591_v20 = vrot.slane %v1236_v17, %v10519_v62  ;;  %v1736_v52 = vsub.f32 %v1734_v31, %v1735_v46  ;;  %v10595_v54 = vrot.slane %v910_v26, %v10519_v62  ;;  %v10598_v56 = vrot.slane %v926_v30, %v10519_v62 }
 0x229   :  { %v10574_v32 = vsub.f32 %v1621_v15, %v10566_v25  ;;  %v1167_v57 = vcombine.low %v1134_v22, %v1150_v27  ;;  %v1168_v58 = vcombine.high %v1134_v22, %v1150_v27  ;;  %v824_v59 = vrot.slane %v810_v37, %v10517_v55 }
 0x22a   :  { %v841_v60 = vcombine.low %v817_v45, %v833_v44  ;;  %v842_v61 = vcombine.high %v817_v45, %v833_v44  ;;  %v1737_v63 = vand.u32 4294901760, %v1736_v52  ;;  %v10602_v1 = vsub.f32 %v2076_v29, %v10582_v48 }
 0x22b   :  { %v1694_v47 = vand.u32 4294901760, %v10574_v32  ;;  %v1159_v2 = vrot.slane %v1151_v35, %v10519_v62  ;;  %v10606_v3 = vsub.f32 %v2073_v34, %v10585_v50  ;;  %v1253_v4 = vcombine.low %v10588_v51, %v10591_v20 }
 0x22c   :  { %v857_v5 = vcombine.low %v824_v59, %v840_v49  ;;  %v858_v6 = vcombine.high %v824_v59, %v840_v49  ;;  %9622 = vmatpush3.xpose.msra.mxu1 %v1737_v63  ;;  %v943_v7 = vcombine.low %v10595_v54, %v10598_v56  ;;  %v1166_v8 = vrot.slane %v1152_v36, %v10519_v62 }
 0x22d   :  { %v1695_v53 = vsub.f32 %v10574_v32, %v1694_v47  ;;  %v1175_v9 = vrot.slane %v1167_v57, %v10519_v62  ;;  %v1182_v10 = vrot.slane %v1168_v58, %v10519_v62  ;;  %9631 = vmatprep.subr.mxu1 %v10287_v41  ;;  %v849_v11 = vrot.slane %v841_v60, %v10519_v62 }
 0x22e   :  { %v856_v12 = vrot.slane %v842_v61, %v10519_v62  ;;  %v2187_v13 = vand.u32 4294901760, %v10602_v1  ;;  %v2146_v14 = vand.u32 4294901760, %v10606_v3  ;;  %v2528_v15 = vsel %vm1619_vm2, %v1253_v4, 0 }
 0x22f   :  { %v1696_v0 = vand.u32 4294901760, %v1695_v53  ;;  %9624 = vmatmul.mubr.f32.vlgmr.msra.gmra.mxu1 %v10566_v25  ;;  %v865_v16 = vrot.slane %v857_v5, %v10519_v62  ;;  %v872_v17 = vrot.slane %v858_v6, %v10519_v62  ;;  %v2525_v18 = vsel %vm1619_vm2, %v943_v7, 0 }
 0x230   :  { %9632 = vmatpush3.xpose.msra.mxu1 %v10564_v24  ;;  %9633 = vmatprep.mubr.msk.f32.mxu1 %vm10289_vm1, %v10287_v41  ;;  %v1255_v19 = vcombine.low %v1159_v2, %v1166_v8  ;;  %v9282_v21 = vcombine.high %v1159_v2, %v1166_v8  ;;  %v1271_v22 = vcombine.low %v1175_v9, %v1182_v10  ;;  %v10638_v28 = vand.u32 4294901760, %v2528_v15 }
 0x231   :  { %9619 = vmatmul.mubr.f32.vlgmr.msra.gmra.mxu0 %v1696_v0  ;;  %9641 = vmatprep.subr.mxu1 %v10287_v41  ;;  %v9283_v23 = vcombine.high %v1175_v9, %v1182_v10  ;;  %v945_v26 = vcombine.low %v849_v11, %v856_v12  ;;  %v2188_v27 = vsub.f32 %v10602_v1, %v2187_v13 }
 0x232   :  { %9627 = vmatpush3.xpose.msra.mxu0 %v1734_v31  ;;  %9628 = vmatprep.mubr.msk.f32.mxu0 %vm10289_vm1, %v10287_v41  ;;  %v9278_v29 = vcombine.high %v849_v11, %v856_v12  ;;  %v2147_v30 = vsub.f32 %v10606_v3, %v2146_v14  ;;  %v10644_v31 = vand.u32 4294901760, %v2525_v18  ;;  %v9279_v34 = vcombine.high %v865_v16, %v872_v17 }
 0x233   :  { %9636 = vmatprep.subr.mxu0 %v10287_v41  ;;  %9634 = vmatmul.mubr.f32.vlgmr.msra.gmra.mxu1 %v1694_v47  ;;  %v10650_v35 = vrot.slane %v1255_v19, %v10517_v55  ;;  %v10653_v36 = vrot.slane %v9282_v21, %v10517_v55  ;;  %v10656_v37 = vrot.slane %v1271_v22, %v10517_v55  ;;  %v2189_v45 = vand.u32 4294901760, %v2188_v27 }
 0x234   :  { %9642 = vmatpush3.xpose.msra.mxu1 %v10564_v24  ;;  %9643 = vmatprep.mubr.msk.f32.mxu1 %vm10289_vm1, %v10287_v41  ;;  %v10661_v44 = vrot.slane %v9283_v23, %v10517_v55  ;;  %v10664_v24 = vrot.slane %v945_v26, %v10517_v55  ;;  %v10673_v47 = vrot.slane %v9278_v29, %v10517_v55  ;;  %v2148_v49 = vand.u32 4294901760, %v2147_v30 }
 0x235   :  { %9629 = vmatmul.mubr.f32.vlgmr.msra.gmra.mxu0 %v10574_v32  ;;  %v961_v32 = vcombine.low %v865_v16, %v872_v17  ;;  %9651 = vmatprep.subr.mxu1 %v10287_v41  ;;  %v10678_v52 = vsub.f32 %v2525_v18, %v10644_v31  ;;  %v1254_v53 = vcombine.high %v10588_v51, %v10591_v20 }
 0x236   :  { %9637 = vmatpush3.xpose.msra.mxu0 %v1735_v46  ;;  %9638 = vmatprep.mubr.msk.f32.mxu0 %vm10289_vm1, %v10287_v41  ;;  %v10670_v46 = vsub.f32 %v2528_v15, %v10638_v28  ;;  %v10686_v58 = vrot.slane %v9279_v34, %v10517_v55  ;;  %v1287_v20 = vcombine.low %v10650_v35, %v10653_v36 }
 0x237   :  { %9646 = vmatprep.subr.mxu0 %v10287_v41  ;;  %9644 = vmatmul.mubr.f32.vlgmr.msra.gmra.mxu1 %v10566_v25  ;;  %v10683_v57 = vrot.slane %v961_v32, %v10517_v55  ;;  %v1303_v59 = vcombine.low %v10656_v37, %v10661_v44  ;;  %v977_v60 = vcombine.low %v10664_v24, %v10673_v47 }
 0x238   :  { %9652 = vmatpush3.xpose.msra.mxu1 %v2189_v45  ;;  %9653 = vmatprep.mubr.msk.f32.mxu1 %vm10289_vm1, %v10287_v41  ;;  %v2639_v51 = vand.u32 4294901760, %v10670_v46  ;;  %v10729_v6 = vrot.slane %v1287_v20, %v10519_v62  ;;  %v1288_v30 = vcombine.high %v10650_v35, %v10653_v36  ;;  %v978_v45 = vcombine.high %v10664_v24, %v10673_v47 }
 0x239   :  { %9639 = vmatmul.mubr.f32.vlgmr.msra.gmra.mxu0 %v10566_v25  ;;  %v944_v25 = vcombine.high %v10595_v54, %v10598_v56  ;;  %9661 = vmatprep.subr.mxu1 %v10287_v41  ;;  %v2598_v54 = vand.u32 4294901760, %v10678_v52  ;;  %v2980_v56 = vsel %vm1619_vm2, %v1254_v53, 0  ;;  %v993_v61 = vcombine.low %v10683_v57, %v10686_v58 }
 0x23a   :  { %9647 = vmatpush3.xpose.msra.mxu0 %v10582_v48  ;;  %9648 = vmatprep.mubr.msk.f32.mxu0 %vm10289_vm1, %v10287_v41  ;;  %v2640_v0 = vsub.f32 %v10670_v46, %v2639_v51  ;;  %v10720_v2 = vand.u32 4294901760, %v2980_v56  ;;  %v10841_v47 = vrot.slane %v1288_v30, %v10519_v62 }
 0x23b   :  { %9656 = vmatprep.subr.mxu0 %v10287_v41  ;;  %9654 = vmatmul.mubr.f32.vlgmr.msra.gmra.mxu1 %v10585_v50  ;;  %v2977_v63 = vsel %vm1619_vm2, %v944_v25, 0  ;;  %v2599_v4 = vsub.f32 %v10678_v52, %v2598_v54  ;;  %v10741_v7 = vrot.slane %v993_v61, %v10519_v62 }
 0x23c   :  { %9662 = vmatpush3.xpose.msra.mxu1 %v10582_v48  ;;  %9663 = vmatprep.mubr.msk.f32.mxu1 %vm10289_vm1, %v10287_v41  ;;  %v10726_v5 = vand.u32 4294901760, %v2977_v63  ;;  %v2641_v8 = vand.u32 4294901760, %v2640_v0 }
 0x23d   :  { %9649 = vmatmul.mubr.f32.vlgmr.msra.gmra.mxu0 %v2148_v49  ;;  %9671 = vmatprep.subr.mxu1 %v10287_v41  ;;  %v2600_v9 = vand.u32 4294901760, %v2599_v4 }
 0x23e   :  { %9657 = vmatpush3.xpose.msra.mxu0 %v10602_v1  ;;  %9658 = vmatprep.mubr.msk.f32.mxu0 %vm10289_vm1, %v10287_v41  ;;  %v10732_v1 = vrot.slane %v1303_v59, %v10519_v62  ;;  %v10754_v10 = vsub.f32 %v2977_v63, %v10726_v5 }
 0x23f   :  { %9666 = vmatprep.subr.mxu0 %v10287_v41  ;;  %9664 = vmatmul.mubr.f32.vlgmr.msra.gmra.mxu1 %v2146_v14 }
 0x240   :  { %9672 = vmatpush3.xpose.msra.mxu1 %v10582_v48  ;;  %9673 = vmatprep.mubr.msk.f32.mxu1 %vm10289_vm1, %v10287_v41  ;;  %v10749_v48 = vsub.f32 %v2980_v56, %v10720_v2  ;;  %v1319_v11 = vcombine.low %v10729_v6, %v10732_v1  ;;  %v1320_v27 = vcombine.high %v10729_v6, %v10732_v1 }
 0x241   :  { %9659 = vmatmul.mubr.f32.vlgmr.msra.gmra.mxu0 %v10606_v3  ;;  %v10738_v3 = vrot.slane %v977_v60, %v10519_v62  ;;  %9681 = vmatprep.subr.mxu1 %v10287_v41 }
 0x242   :  { %9667 = vmatpush3.xpose.msra.mxu0 %v2187_v13  ;;  %9668 = vmatprep.mubr.msk.f32.mxu0 %vm10289_vm1, %v10287_v41  ;;  %v3050_v13 = vand.u32 4294901760, %v10754_v10  ;;  %v3432_v14 = vsel %vm1619_vm2, %v1319_v11, 0  ;;  %v3884_v34 = vsel %vm1619_vm2, %v1320_v27, 0 }
 0x243   :  { %9676 = vmatprep.subr.mxu0 %v10287_v41  ;;  %9674 = vmatmul.mubr.f32.vlgmr.msra.gmra.mxu1 %v10585_v50  ;;  %v1009_v12 = vcombine.low %v10738_v3, %v10741_v7  ;;  %v10780_v17 = vand.u32 4294901760, %v3432_v14 }
 0x244   :  { %9682 = vmatpush3.xpose.msra.mxu1 %v2641_v8  ;;  %9683 = vmatprep.mubr.msk.f32.mxu1 %vm10289_vm1, %v10287_v41  ;;  %v3051_v18 = vsub.f32 %v10754_v10, %v3050_v13 }
 0x245   :  { %9669 = vmatmul.mubr.f32.vlgmr.msra.gmra.mxu0 %v10585_v50  ;;  %9691 = vmatprep.subr.mxu1 %v10287_v41  ;;  %v3091_v50 = vand.u32 4294901760, %v10749_v48  ;;  %v3429_v15 = vsel %vm1619_vm2, %v1009_v12, 0  ;;  %v10795_v22 = vsub.f32 %v3432_v14, %v10780_v17 }
 0x246   :  { %9677 = vmatpush3.xpose.msra.mxu0 %v10638_v28  ;;  %9678 = vmatprep.mubr.msk.f32.mxu0 %vm10289_vm1, %v10287_v41  ;;  %v10784_v19 = vand.u32 4294901760, %v3429_v15  ;;  %v3052_v23 = vand.u32 4294901760, %v3051_v18 }
 0x247   :  { %9686 = vmatprep.subr.mxu0 %v10287_v41  ;;  %9684 = vmatmul.mubr.f32.vlgmr.msra.gmra.mxu1 %v10644_v31  ;;  %v3092_v16 = vsub.f32 %v10749_v48, %v3091_v50  ;;  %v3543_v29 = vand.u32 4294901760, %v10795_v22 }
 0x248   :  { %9692 = vmatpush3.xpose.msra.mxu1 %v10638_v28  ;;  %9693 = vmatprep.mubr.msk.f32.mxu1 %vm10289_vm1, %v10287_v41  ;;  %v10800_v26 = vsub.f32 %v3429_v15, %v10784_v19 }
 0x249   :  { %9679 = vmatmul.mubr.f32.vlgmr.msra.gmra.mxu0 %v2600_v9  ;;  %9701 = vmatprep.subr.mxu1 %v10287_v41  ;;  %v3093_v21 = vand.u32 4294901760, %v3092_v16  ;;  %v3544_v36 = vsub.f32 %v10795_v22, %v3543_v29 }
 0x24a   :  { %9687 = vmatpush3.xpose.msra.mxu0 %v10670_v46  ;;  %9688 = vmatprep.mubr.msk.f32.mxu0 %vm10289_vm1, %v10287_v41  ;;  %v3502_v32 = vand.u32 4294901760, %v10800_v26  ;;  %v994_v46 = vcombine.high %v10683_v57, %v10686_v58 }
 0x24b   :  { %9696 = vmatprep.subr.mxu0 %v10287_v41  ;;  %9694 = vmatmul.mubr.f32.vlgmr.msra.gmra.mxu1 %v2598_v54  ;;  %v3545_v57 = vand.u32 4294901760, %v3544_v36 }
 0x24c   :  { %9702 = vmatpush3.xpose.msra.mxu1 %v10638_v28  ;;  %9703 = vmatprep.mubr.msk.f32.mxu1 %vm10289_vm1, %v10287_v41  ;;  %v1010_v28 = vcombine.high %v10738_v3, %v10741_v7  ;;  %v10853_v53 = vrot.slane %v994_v46, %v10519_v62 }
 0x24d   :  { %9689 = vmatmul.mubr.f32.vlgmr.msra.gmra.mxu0 %v10678_v52  ;;  %9711 = vmatprep.subr.mxu1 %v10287_v41  ;;  %v10850_v52 = vrot.slane %v978_v45, %v10519_v62 }
 0x24e   :  { %9697 = vmatpush3.xpose.msra.mxu0 %v2639_v51  ;;  %9698 = vmatprep.mubr.msk.f32.mxu0 %vm10289_vm1, %v10287_v41  ;;  %v3881_v35 = vsel %vm1619_vm2, %v1010_v28, 0 }
 0x24f   :  { %9706 = vmatprep.subr.mxu0 %v10287_v41  ;;  %9704 = vmatmul.mubr.f32.vlgmr.msra.gmra.mxu1 %v10644_v31  ;;  %v10838_v24 = vand.u32 4294901760, %v3881_v35  ;;  %v1011_v59 = vcombine.low %v10850_v52, %v10853_v53  ;;  %v1012_v8 = vcombine.high %v10850_v52, %v10853_v53 }
 0x250   :  { %9712 = vmatpush3.xpose.msra.mxu1 %v3093_v21  ;;  %9713 = vmatprep.mubr.msk.f32.mxu1 %vm10289_vm1, %v10287_v41 }
 0x251   :  { %9699 = vmatmul.mubr.f32.vlgmr.msra.gmra.mxu0 %v10644_v31  ;;  %9721 = vmatprep.subr.mxu1 %v10287_v41  ;;  %v1304_v31 = vcombine.high %v10656_v37, %v10661_v44  ;;  %v10834_v37 = vand.u32 4294901760, %v3884_v34  ;;  %v3503_v44 = vsub.f32 %v10800_v26, %v3502_v32  ;;  %v3953_v51 = vsub.f32 %v3881_v35, %v10838_v24 }
 0x252   :  { %9707 = vmatpush3.xpose.msra.mxu0 %v10720_v2  ;;  %9708 = vmatprep.mubr.msk.f32.mxu0 %vm10289_vm1, %v10287_v41  ;;  %v4333_v61 = vsel %vm1619_vm2, %v1011_v59, 0  ;;  %v4785_v11 = vsel %vm1619_vm2, %v1012_v8, 0 }
 0x253   :  { %9716 = vmatprep.subr.mxu0 %v10287_v41  ;;  %9714 = vmatmul.mubr.f32.vlgmr.msra.gmra.mxu1 %v10726_v5  ;;  %v10844_v49 = vrot.slane %v1304_v31, %v10519_v62  ;;  %v3994_v58 = vsub.f32 %v3884_v34, %v10834_v37  ;;  %v3504_v25 = vand.u32 4294901760, %v3503_v44  ;;  %v3954_v56 = vand.u32 4294901760, %v3953_v51 }
 0x254   :  { %9722 = vmatpush3.xpose.msra.mxu1 %v10720_v2  ;;  %9723 = vmatprep.mubr.msk.f32.mxu1 %vm10289_vm1, %v10287_v41  ;;  %v10888_v4 = vand.u32 4294901760, %v4333_v61  ;;  %v10922_v14 = vand.u32 4294901760, %v4785_v11 }
 0x255   :  { %9709 = vmatmul.mubr.f32.vlgmr.msra.gmra.mxu0 %v3052_v23  ;;  %9731 = vmatprep.subr.mxu1 %v10287_v41  ;;  %v1321_v20 = vcombine.low %v10841_v47, %v10844_v49  ;;  %v3995_v54 = vand.u32 4294901760, %v3994_v58  ;;  %v1322_v7 = vcombine.high %v10841_v47, %v10844_v49  ;;  %v10980_v49 = vld [vmem:[#allocation7] sm:$0xff] }
 0x256   :  { %9717 = vmatpush3.xpose.msra.mxu0 %v10749_v48  ;;  %9718 = vmatprep.mubr.msk.f32.mxu0 %vm10289_vm1, %v10287_v41  ;;  %v4405_v3 = vsub.f32 %v4333_v61, %v10888_v4  ;;  %v4857_v18 = vsub.f32 %v4785_v11, %v10922_v14 }
 0x257   :  { %9726 = vmatprep.subr.mxu0 %v10287_v41  ;;  %9724 = vmatmul.mubr.f32.vlgmr.msra.gmra.mxu1 %v3050_v13  ;;  %v4336_v60 = vsel %vm1619_vm2, %v1321_v20, 0  ;;  %v3996_v63 = vsub.f32 %v3994_v58, %v3995_v54 }
 0x258   :  { %9732 = vmatpush3.xpose.msra.mxu1 %v10720_v2  ;;  %9733 = vmatprep.mubr.msk.f32.mxu1 %vm10289_vm1, %v10287_v41  ;;  %v10885_v0 = vand.u32 4294901760, %v4336_v60  ;;  %v3955_v2 = vsub.f32 %v3953_v51, %v3954_v56  ;;  %v4406_v9 = vand.u32 4294901760, %v4405_v3  ;;  %v4858_v21 = vand.u32 4294901760, %v4857_v18 }
 0x259   :  { %9719 = vmatmul.mubr.f32.vlgmr.msra.gmra.mxu0 %v10754_v10  ;;  %9741 = vmatprep.subr.mxu1 %v10287_v41  ;;  %v4788_v10 = vsel %vm1619_vm2, %v1322_v7, 0 }
 0x25a   :  { %9727 = vmatpush3.xpose.msra.mxu0 %v3091_v50  ;;  %9728 = vmatprep.mubr.msk.f32.mxu0 %vm10289_vm1, %v10287_v41  ;;  %v4446_v6 = vsub.f32 %v4336_v60, %v10885_v0  ;;  %v3956_v1 = vand.u32 4294901760, %v3955_v2  ;;  %v4821_v50 = vand.u32 4294901760, %v4788_v10  ;;  %v4407_v13 = vsub.f32 %v4405_v3, %v4406_v9 }
 0x25b   :  { %9736 = vmatprep.subr.mxu0 %v10287_v41  ;;  %9734 = vmatmul.mubr.f32.vlgmr.msra.gmra.mxu1 %v10726_v5  ;;  %v4859_v23 = vsub.f32 %v4857_v18, %v4858_v21 }
 0x25c   :  { %9742 = vmatpush3.xpose.msra.mxu1 %v3545_v57  ;;  %9743 = vmatprep.mubr.msk.f32.mxu1 %vm10289_vm1, %v10287_v41  ;;  %v4447_v48 = vand.u32 4294901760, %v4446_v6  ;;  %v4898_v16 = vsub.f32 %v4788_v10, %v4821_v50 }
 0x25d   :  { %9729 = vmatmul.mubr.f32.vlgmr.msra.gmra.mxu0 %v10726_v5  ;;  %9751 = vmatprep.subr.mxu1 %v10287_v41  ;;  %v3997_v5 = vand.u32 4294901760, %v3996_v63  ;;  %v4860_v27 = vand.u32 4294901760, %v4859_v23 }
 0x25e   :  { %9737 = vmatpush3.xpose.msra.mxu0 %v10780_v17  ;;  %9738 = vmatprep.mubr.msk.f32.mxu0 %vm10289_vm1, %v10287_v41  ;;  %v4448_v12 = vsub.f32 %v4446_v6, %v4447_v48 }
 0x25f   :  { %9746 = vmatprep.subr.mxu0 %v10287_v41  ;;  %9744 = vmatmul.mubr.f32.vlgmr.msra.gmra.mxu1 %v10784_v19 }
 0x260   :  { %9752 = vmatpush3.xpose.msra.mxu1 %v10780_v17  ;;  %9753 = vmatprep.mubr.msk.f32.mxu1 %vm10289_vm1, %v10287_v41  ;;  %v4449_v15 = vand.u32 4294901760, %v4448_v12 }
 0x261   :  { %9739 = vmatmul.mubr.f32.vlgmr.msra.gmra.mxu0 %v3504_v25  ;;  %9761 = vmatprep.subr.mxu1 %v10287_v41 }
 0x262   :  { %9747 = vmatpush3.xpose.msra.mxu0 %v10795_v22  ;;  %9748 = vmatprep.mubr.msk.f32.mxu0 %vm10289_vm1, %v10287_v41 }
 0x263   :  { %9756 = vmatprep.subr.mxu0 %v10287_v41  ;;  %9754 = vmatmul.mubr.f32.vlgmr.msra.gmra.mxu1 %v3502_v32 }
 0x264   :  { %9762 = vmatpush3.xpose.msra.mxu1 %v10780_v17  ;;  %9763 = vmatprep.mubr.msk.f32.mxu1 %vm10289_vm1, %v10287_v41  ;;  %v4408_v17 = vand.u32 4294901760, %v4407_v13 }
 0x265   :  { %9749 = vmatmul.mubr.f32.vlgmr.msra.gmra.mxu0 %v10800_v26  ;;  %9771 = vmatprep.subr.mxu1 %v10287_v41 }
 0x266   :  { %9757 = vmatpush3.xpose.msra.mxu0 %v3543_v29  ;;  %9758 = vmatprep.mubr.msk.f32.mxu0 %vm10289_vm1, %v10287_v41 }
 0x267   :  { %9766 = vmatprep.subr.mxu0 %v10287_v41  ;;  %9764 = vmatmul.mubr.f32.vlgmr.msra.gmra.mxu1 %v10784_v19 }
 0x268   :  { %9772 = vmatpush3.xpose.msra.mxu1 %v3997_v5  ;;  %9773 = vmatprep.mubr.msk.f32.mxu1 %vm10289_vm1, %v10287_v41 }
 0x269   :  { %9759 = vmatmul.mubr.f32.vlgmr.msra.gmra.mxu0 %v10784_v19  ;;  %9781 = vmatprep.subr.mxu1 %v10287_v41  ;;  %v4899_v19 = vand.u32 4294901760, %v4898_v16 }
 0x26a   :  { %9767 = vmatpush3.xpose.msra.mxu0 %v10834_v37  ;;  %9768 = vmatprep.mubr.msk.f32.mxu0 %vm10289_vm1, %v10287_v41 }
 0x26b   :  { %9776 = vmatprep.subr.mxu0 %v10287_v41  ;;  %9774 = vmatmul.mubr.f32.vlgmr.msra.gmra.mxu1 %v10838_v24  ;;  %v4900_v22 = vsub.f32 %v4898_v16, %v4899_v19 }
 0x26c   :  { %9782 = vmatpush3.xpose.msra.mxu1 %v10834_v37  ;;  %9783 = vmatprep.mubr.msk.f32.mxu1 %vm10289_vm1, %v10287_v41 }
 0x26d   :  { %9769 = vmatmul.mubr.f32.vlgmr.msra.gmra.mxu0 %v3956_v1  ;;  %9791 = vmatprep.subr.mxu1 %v10287_v41  ;;  %v4901_v26 = vand.u32 4294901760, %v4900_v22 }
 0x26e   :  { %9777 = vmatpush3.xpose.msra.mxu0 %v3994_v58  ;;  %9778 = vmatprep.mubr.msk.f32.mxu0 %vm10289_vm1, %v10287_v41 }
 0x26f   :  { %9786 = vmatprep.subr.mxu0 %v10287_v41  ;;  %9784 = vmatmul.mubr.f32.vlgmr.msra.gmra.mxu1 %v3954_v56 }
 0x270   :  { %9792 = vmatpush3.xpose.msra.mxu1 %v10834_v37  ;;  %9793 = vmatprep.mubr.msk.f32.mxu1 %vm10289_vm1, %v10287_v41 }
 0x271   :  { %9779 = vmatmul.mubr.f32.vlgmr.msra.gmra.mxu0 %v3953_v51  ;;  %9801 = vmatprep.subr.mxu1 %v10287_v41 }
 0x272   :  { %9787 = vmatpush3.xpose.msra.mxu0 %v3995_v54  ;;  %9788 = vmatprep.mubr.msk.f32.mxu0 %vm10289_vm1, %v10287_v41 }
 0x273   :  { %9796 = vmatprep.subr.mxu0 %v10287_v41  ;;  %9794 = vmatmul.mubr.f32.vlgmr.msra.gmra.mxu1 %v10838_v24 }
 0x274   :  { %9802 = vmatpush3.xpose.msra.mxu1 %v4449_v15  ;;  %9803 = vmatprep.mubr.msk.f32.mxu1 %vm10289_vm1, %v10287_v41 }
 0x275   :  { %9789 = vmatmul.mubr.f32.vlgmr.msra.gmra.mxu0 %v10838_v24  ;;  %9811 = vmatprep.subr.mxu1 %v10287_v41 }
 0x276   :  { %9797 = vmatpush3.xpose.msra.mxu0 %v10885_v0  ;;  %9798 = vmatprep.mubr.msk.f32.mxu0 %vm10289_vm1, %v10287_v41 }
 0x277   :  { %9806 = vmatprep.subr.mxu0 %v10287_v41  ;;  %9804 = vmatmul.mubr.f32.vlgmr.msra.gmra.mxu1 %v10888_v4 }
 0x278   :  { %9812 = vmatpush3.xpose.msra.mxu1 %v10885_v0  ;;  %9813 = vmatprep.mubr.msk.f32.mxu1 %vm10289_vm1, %v10287_v41 }
 0x279   :  { %9799 = vmatmul.mubr.f32.vlgmr.msra.gmra.mxu0 %v4408_v17  ;;  %9821 = vmatprep.subr.mxu1 %v10287_v41 }
 0x27a   :  { %9807 = vmatpush3.xpose.msra.mxu0 %v4446_v6  ;;  %9808 = vmatprep.mubr.msk.f32.mxu0 %vm10289_vm1, %v10287_v41 }
 0x27b   :  { %9816 = vmatprep.subr.mxu0 %v10287_v41  ;;  %9814 = vmatmul.mubr.f32.vlgmr.msra.gmra.mxu1 %v4406_v9 }
 0x27c   :  { %9822 = vmatpush3.xpose.msra.mxu1 %v10885_v0  ;;  %9823 = vmatprep.mubr.msk.f32.mxu1 %vm10289_vm1, %v10287_v41 }
 0x27d   :  { %9809 = vmatmul.mubr.f32.vlgmr.msra.gmra.mxu0 %v4405_v3  ;;  %9831 = vmatprep.subr.mxu1 %v10287_v41 }
 0x27e   :  { %9817 = vmatpush3.xpose.msra.mxu0 %v4447_v48  ;;  %9818 = vmatprep.mubr.msk.f32.mxu0 %vm10289_vm1, %v10287_v41 }
 0x27f   :  { %9826 = vmatprep.subr.mxu0 %v10287_v41  ;;  %9824 = vmatmul.mubr.f32.vlgmr.msra.gmra.mxu1 %v10888_v4 }
 0x280   :  { %9832 = vmatpush3.xpose.msra.mxu1 %v4901_v26  ;;  %9833 = vmatprep.mubr.msk.f32.mxu1 %vm10289_vm1, %v10287_v41 }
 0x281   :  { %9819 = vmatmul.mubr.f32.vlgmr.msra.gmra.mxu0 %v10888_v4  ;;  %9841 = vmatprep.subr.mxu1 %v10287_v41 }
 0x282   :  { %9827 = vmatpush3.xpose.msra.mxu0 %v4821_v50  ;;  %9828 = vmatprep.mubr.msk.f32.mxu0 %vm10289_vm1, %v10287_v41 }
 0x283   :  { %9836 = vmatprep.subr.mxu0 %v10287_v41  ;;  %9834 = vmatmul.mubr.f32.vlgmr.msra.gmra.mxu1 %v10922_v14 }
 0x284   :  { %9842 = vmatpush3.xpose.msra.mxu1 %v4821_v50  ;;  %9843 = vmatprep.mubr.msk.f32.mxu1 %vm10289_vm1, %v10287_v41 }
 0x285   :  { %9829 = vmatmul.mubr.f32.vlgmr.msra.gmra.mxu0 %v4860_v27  ;;  %9851 = vmatprep.subr.mxu1 %v10287_v41 }
 0x286   :  { %9837 = vmatpush3.xpose.msra.mxu0 %v4898_v16  ;;  %9838 = vmatprep.mubr.msk.f32.mxu0 %vm10289_vm1, %v10287_v41 }
 0x287   :  { %9846 = vmatprep.subr.mxu0 %v10287_v41  ;;  %9844 = vmatmul.mubr.f32.vlgmr.msra.gmra.mxu1 %v4858_v21 }
 0x288   :  { %9852 = vmatpush3.xpose.msra.mxu1 %v4821_v50  ;;  %9853 = vmatprep.mubr.msk.f32.mxu1 %vm10289_vm1, %v10287_v41 }
 0x289   :  { %9839 = vmatmul.mubr.f32.vlgmr.msra.gmra.mxu0 %v4857_v18  ;;  %9861 = vmatprep.subr.mxu1 %v10287_v41 }
 0x28a   :  { %9847 = vmatpush3.xpose.msra.mxu0 %v4899_v19  ;;  %9848 = vmatprep.mubr.msk.f32.mxu0 %vm10289_vm1, %v10287_v41 }
 0x28b   :  { %9856 = vmatprep.subr.mxu0 %v10287_v41  ;;  %9854 = vmatmul.mubr.f32.vlgmr.msra.gmra.mxu1 %v10922_v14 }
 0x28c   :  { %9863 = vmatprep.mubr.msk.f32.mxu1 %vm10289_vm1, %v10287_v41 }
 0x28d   :  { %9849 = vmatmul.mubr.f32.vlgmr.msra.gmra.mxu0 %v10922_v14 }
 0x28e   :  { %9858 = vmatprep.mubr.msk.f32.mxu0 %vm10289_vm1, %v10287_v41 }
 0x2ef   :  { %v1774_v30 = vpop.f32.mrf.mxu1 }
 0x2f1   :  { %v1698_v28 = vpop.f32.mrf.mxu0  ;;  %v9625_v32 = vpop.f32.mrf.mxu1 }
 0x2f2   :  { %v1775_v31 = vadd.f32 %v1774_v30, %v1698_v28 }
 0x2f3   :  { %v9620_v29 = vpop.f32.mrf.mxu0  ;;  %v1922_v46 = vpop.f32.mrf.mxu1 }
 0x2f5   :  { %v1848_v34 = vpop.f32.mrf.mxu0  ;;  %v9635_v37 = vpop.f32.mrf.mxu1 }
 0x2f6   :  { %v1849_v45 = vadd.f32 %v1848_v34, %v1775_v31 }
 0x2f7   :  { %v9630_v35 = vpop.f32.mrf.mxu0  ;;  %v2068_v47 = vpop.f32.mrf.mxu1 }
 0x2f8   :  { %v1923_v36 = vadd.f32 %v1922_v46, %v1849_v45 }
 0x2f9   :  { %v1996_v44 = vpop.f32.mrf.mxu0  ;;  %v9645_v57 = vpop.f32.mrf.mxu1 }
 0x2fa   :  { %v1997_v24 = vadd.f32 %v1996_v44, %v1923_v36 }
 0x2fb   :  { %v9640_v52 = vpop.f32.mrf.mxu0  ;;  %v2226_v51 = vpop.f32.mrf.mxu1 }
 0x2fc   :  { %v2069_v53 = vadd.f32 %v2068_v47, %v1997_v24 }
 0x2fd   :  { %v2150_v58 = vpop.f32.mrf.mxu0  ;;  %v9655_v56 = vpop.f32.mrf.mxu1 }
 0x2fe   :  { %v10983_v25 = vadd.f32 %v10980_v49, %v2069_v53  ;;  %v2227_v59 = vadd.f32 %v2226_v51, %v2150_v58 }
 0x2ff   :  { %v9650_v20 = vpop.f32.mrf.mxu0  ;;  %v2374_v63 = vpop.f32.mrf.mxu1 }
 0x300   :  { %5246 = vst.msk [vmem:[#allocation11] sm:$0xff] %vm1619_vm2, %v10983_v25  ;;  %v5254_v54 = vsel %vm1619_vm2, %v10983_v25, -inf }
 0x301   :  { %5255 = vmax.xlane.f32.xlu0 %v5254_v54  ;;  %v2300_v60 = vpop.f32.mrf.mxu0  ;;  %v9665_v4 = vpop.f32.mrf.mxu1 }
 0x302   :  { %v2301_v61 = vadd.f32 %v2300_v60, %v2227_v59 }
 0x303   :  { %v9660_v0 = vpop.f32.mrf.mxu0  ;;  %v2520_v1 = vpop.f32.mrf.mxu1 }
 0x304   :  { %v2375_v2 = vadd.f32 %v2374_v63, %v2301_v61 }
 0x305   :  { %v2448_v5 = vpop.f32.mrf.mxu0  ;;  %v9675_v8 = vpop.f32.mrf.mxu1 }
 0x306   :  { %v2449_v6 = vadd.f32 %v2448_v5, %v2375_v2  ;;  %v11012_v8 = vld [vmem:[#allocation7 + $0x8] sm:$0xff] }
 0x307   :  { %v9670_v3 = vpop.f32.mrf.mxu0  ;;  %v2678_v10 = vpop.f32.mrf.mxu1 }
 0x308   :  { %v2521_v7 = vadd.f32 %v2520_v1, %v2449_v6 }
 0x309   :  { %v2602_v48 = vpop.f32.mrf.mxu0  ;;  %v9685_v13 = vpop.f32.mrf.mxu1 }
 0x30a   :  { %v10990_v9 = vadd.f32 %v10980_v49, %v2521_v7  ;;  %v2679_v12 = vadd.f32 %v2678_v10, %v2602_v48 }
 0x30b   :  { %v9680_v11 = vpop.f32.mrf.mxu0  ;;  %v2826_v16 = vpop.f32.mrf.mxu1 }
 0x30c   :  { %5247 = vst.msk [vmem:[#allocation11 + $0x8] sm:$0xff] %vm1619_vm2, %v10990_v9  ;;  %v5257_v50 = vsel %vm1619_vm2, %v10990_v9, -inf }
 0x30d   :  { %5258 = vmax.xlane.f32.xlu1 %v5257_v50  ;;  %v2752_v14 = vpop.f32.mrf.mxu0  ;;  %v9695_v19 = vpop.f32.mrf.mxu1 }
 0x30e   :  { %v2753_v15 = vadd.f32 %v2752_v14, %v2679_v12 }
 0x30f   :  { %v9690_v17 = vpop.f32.mrf.mxu0  ;;  %v2972_v23 = vpop.f32.mrf.mxu1 }
 0x310   :  { %v2827_v18 = vadd.f32 %v2826_v16, %v2753_v15 }
 0x311   :  { %v2900_v21 = vpop.f32.mrf.mxu0  ;;  %v9705_v28 = vpop.f32.mrf.mxu1 }
 0x312   :  { %v2901_v22 = vadd.f32 %v2900_v21, %v2827_v18 }
 0x313   :  { %v9700_v26 = vpop.f32.mrf.mxu0  ;;  %v3130_v31 = vpop.f32.mrf.mxu1 }
 0x314   :  { %v2973_v27 = vadd.f32 %v2972_v23, %v2901_v22 }
 0x315   :  { %v3054_v29 = vpop.f32.mrf.mxu0  ;;  %v9715_v46 = vpop.f32.mrf.mxu1 }
 0x316   :  { %v10997_v30 = vadd.f32 %v10980_v49, %v2973_v27  ;;  %v3131_v34 = vadd.f32 %v3130_v31, %v3054_v29 }
 0x317   :  { %v9710_v32 = vpop.f32.mrf.mxu0  ;;  %v3278_v37 = vpop.f32.mrf.mxu1 }
 0x318   :  { %5248 = vst.msk [vmem:[#allocation11 + $0x10] sm:$0xff] %vm1619_vm2, %v10997_v30  ;;  %v5260_v45 = vsel %vm1619_vm2, %v10997_v30, -inf }
 0x319   :  { %5261 = vmax.xlane.f32.xlu0 %v5260_v45  ;;  %v3204_v35 = vpop.f32.mrf.mxu0  ;;  %v9725_v47 = vpop.f32.mrf.mxu1 }
 0x31a   :  { %v3205_v36 = vadd.f32 %v3204_v35, %v3131_v34 }
 0x31b   :  { %v9720_v44 = vpop.f32.mrf.mxu0  ;;  %v3424_v57 = vpop.f32.mrf.mxu1 }
 0x31c   :  { %v3279_v24 = vadd.f32 %v3278_v37, %v3205_v36 }
 0x31d   :  { %v3352_v52 = vpop.f32.mrf.mxu0  ;;  %v9735_v20 = vpop.f32.mrf.mxu1 }
 0x31e   :  { %v3353_v53 = vadd.f32 %v3352_v52, %v3279_v24  ;;  %1331 = vrot.lane.b32.xlu1 %v10487_v39, %s10288_s20 }
 0x31f   :  { %v9730_v58 = vpop.f32.mrf.mxu0  ;;  %v3582_v56 = vpop.f32.mrf.mxu1 }
 0x320   :  { %v3425_v51 = vadd.f32 %v3424_v57, %v3353_v53 }
 0x321   :  { %v3506_v59 = vpop.f32.mrf.mxu0  ;;  %v9745_v0 = vpop.f32.mrf.mxu1 }
 0x322   :  { %v11006_v54 = vadd.f32 %v10980_v49, %v3425_v51  ;;  %v3583_v61 = vadd.f32 %v3582_v56, %v3506_v59 }
 0x323   :  { %v9740_v60 = vpop.f32.mrf.mxu0  ;;  %v3730_v4 = vpop.f32.mrf.mxu1 }
 0x324   :  { %5249 = vst.msk [vmem:[#allocation11 + $0x18] sm:$0xff] %vm1619_vm2, %v11006_v54  ;;  %v5263_v63 = vsel %vm1619_vm2, %v11006_v54, -inf }
 0x325   :  { %5264 = vmax.xlane.f32.xlu0 %v5263_v63  ;;  %v3656_v39 = vpop.f32.mrf.mxu0  ;;  %v9755_v1 = vpop.f32.mrf.mxu1 }
 0x326   :  { %v3657_v2 = vadd.f32 %v3656_v39, %v3583_v61 }
 0x327   :  { %v9750_v5 = vpop.f32.mrf.mxu0  ;;  %v3876_v7 = vpop.f32.mrf.mxu1 }
 0x328   :  { %v3731_v6 = vadd.f32 %v3730_v4, %v3657_v2 }
 0x329   :  { %v3804_v3 = vpop.f32.mrf.mxu0  ;;  %v9765_v11 = vpop.f32.mrf.mxu1 }
 0x32a   :  { %v3805_v49 = vadd.f32 %v3804_v3, %v3731_v6 }
 0x32b   :  { %v9760_v48 = vpop.f32.mrf.mxu0  ;;  %v4034_v13 = vpop.f32.mrf.mxu1 }
 0x32c   :  { %v3877_v10 = vadd.f32 %v3876_v7, %v3805_v49 }
 0x32d   :  { %v3958_v12 = vpop.f32.mrf.mxu0  ;;  %v9775_v16 = vpop.f32.mrf.mxu1 }
 0x32e   :  { %v11015_v50 = vadd.f32 %v11012_v8, %v3877_v10  ;;  %v4035_v15 = vadd.f32 %v4034_v13, %v3958_v12 }
 0x32f   :  { %v9770_v14 = vpop.f32.mrf.mxu0  ;;  %v4182_v19 = vpop.f32.mrf.mxu1 }
 0x330   :  { %5250 = vst.msk [vmem:[#allocation11 + $0x20] sm:$0xff] %vm1619_vm2, %v11015_v50  ;;  %v5266_v51 = vsel %vm1619_vm2, %v11015_v50, -inf }
 0x331   :  { %v4108_v17 = vpop.f32.mrf.mxu0  ;;  %v9785_v23 = vpop.f32.mrf.mxu1 }
 0x332   :  { %v4109_v18 = vadd.f32 %v4108_v17, %v4035_v15  ;;  %v1328_v23 = vpop.permute.xlu1 %1327 }
 0x333   :  { %v9780_v21 = vpop.f32.mrf.mxu0  ;;  %v4328_v28 = vpop.f32.mrf.mxu1 }
 0x334   :  { %v4183_v22 = vadd.f32 %v4182_v19, %v4109_v18  ;;  %v1324_v19 = vpop.permute.xlu0 %1323 }
 0x335   :  { %v4256_v26 = vpop.f32.mrf.mxu0  ;;  %v9795_v32 = vpop.f32.mrf.mxu1 }
 0x336   :  { %v4257_v27 = vadd.f32 %v4256_v26, %v4183_v22 }
 0x337   :  { %v9790_v29 = vpop.f32.mrf.mxu0  ;;  %v4486_v46 = vpop.f32.mrf.mxu1 }
 0x338   :  { %v4329_v31 = vadd.f32 %v4328_v28, %v4257_v27 }
 0x339   :  { %v4410_v34 = vpop.f32.mrf.mxu0  ;;  %v9805_v37 = vpop.f32.mrf.mxu1 }
 0x33a   :  { %v11020_v45 = vadd.f32 %v11012_v8, %v4329_v31  ;;  %v4487_v36 = vadd.f32 %v4486_v46, %v4410_v34 }
 0x33b   :  { %1335 = vrot.lane.b32.xlu0 %v10485_v38, %s10288_s20  ;;  %v9800_v35 = vpop.f32.mrf.mxu0  ;;  %v4634_v47 = vpop.f32.mrf.mxu1 }
 0x33c   :  { %5251 = vst.msk [vmem:[#allocation11 + $0x28] sm:$0xff] %vm1619_vm2, %v11020_v45  ;;  %v5269_v17 = vsel %vm1619_vm2, %v11020_v45, -inf }
 0x33d   :  { %v4560_v44 = vpop.f32.mrf.mxu0  ;;  %v9815_v57 = vpop.f32.mrf.mxu1 }
 0x33e   :  { %v4561_v24 = vadd.f32 %v4560_v44, %v4487_v36 }
 0x33f   :  { %v9810_v52 = vpop.f32.mrf.mxu0  ;;  %v4780_v59 = vpop.f32.mrf.mxu1 }
 0x340   :  { %v4635_v53 = vadd.f32 %v4634_v47, %v4561_v24 }
 0x341   :  { %v4708_v58 = vpop.f32.mrf.mxu0  ;;  %v9825_v60 = vpop.f32.mrf.mxu1 }
 0x342   :  { %v4709_v20 = vadd.f32 %v4708_v58, %v4635_v53  ;;  %5267 = vmax.xlane.f32.xlu1 %v5266_v51 }
 0x343   :  { %v9820_v38 = vpop.f32.mrf.mxu0  ;;  %v4938_v0 = vpop.f32.mrf.mxu1 }
 0x344   :  { %v4781_v56 = vadd.f32 %v4780_v59, %v4709_v20 }
 0x345   :  { %v4862_v61 = vpop.f32.mrf.mxu0  ;;  %v9835_v5 = vpop.f32.mrf.mxu1 }
 0x346   :  { %v11029_v63 = vadd.f32 %v11012_v8, %v4781_v56  ;;  %v4939_v2 = vadd.f32 %v4938_v0, %v4862_v61 }
 0x347   :  { %v9830_v39 = vpop.f32.mrf.mxu0  ;;  %v5086_v3 = vpop.f32.mrf.mxu1 }
 0x348   :  { %5252 = vst.msk [vmem:[#allocation11 + $0x30] sm:$0xff] %vm1619_vm2, %v11029_v63  ;;  %v5272_v4 = vsel %vm1619_vm2, %v11029_v63, -inf }
 0x349   :  { %5273 = vmax.xlane.f32.xlu1 %v5272_v4  ;;  %v5012_v6 = vpop.f32.mrf.mxu0  ;;  %v9845_v48 = vpop.f32.mrf.mxu1 }
 0x34a   :  { %v5013_v1 = vadd.f32 %v5012_v6, %v4939_v2 }
 0x34b   :  { %v9840_v49 = vpop.f32.mrf.mxu0  ;;  %v5232_v12 = vpop.f32.mrf.mxu1 }
 0x34c   :  { %v5087_v7 = vadd.f32 %v5086_v3, %v5013_v1 }
 0x34d   :  { %v5160_v10 = vpop.f32.mrf.mxu0  ;;  %v9855_v15 = vpop.f32.mrf.mxu1 }
 0x34e   :  { %v5161_v11 = vadd.f32 %v5160_v10, %v5087_v7 }
 0x34f   :  { %v9850_v13 = vpop.f32.mrf.mxu0 }
 0x350   :  { %v5233_v14 = vadd.f32 %v5232_v12, %v5161_v11 }
 0x352   :  { %v11036_v16 = vadd.f32 %v11012_v8, %v5233_v14 }
 0x354   :  { %5253 = vst.msk [vmem:[#allocation11 + $0x38] sm:$0xff] %vm1619_vm2, %v11036_v16  ;;  %v5275_v18 = vsel %vm1619_vm2, %v11036_v16, -inf }
 0x35a   :  { %5270 = vmax.xlane.f32.xlu0 %v5269_v17  ;;  %1329 = vrot.lane.b32.xlu1 %v10494_v40, %s10288_s20 }
 0x35e   :  { %5276 = vmax.xlane.f32.xlu0 %v5275_v18 }
 0x374   :  { %1325 = vrot.lane.b32.xlu0 %v10474_v33, %s10288_s20 }
 0x38a   :  { %v5256_v8 = vpop.xlane.xlu0 %5255 }
 0x38b   :  { %v5278_v21 = vsub.f32 %v10983_v25, %v5256_v8 }
 0x38d   :  { %v5286_v22 = vmul.f32 1.442695, %v5278_v21 }
 0x38f   :  { %10115 = vpow2.f32 %v5286_v22 }
 0x396   :  { %v5259_v26 = vpop.xlane.xlu1 %5258 }
 0x397   :  { %v5279_v27 = vsub.f32 %v10990_v9, %v5259_v26 }
 0x399   :  { %v5288_v28 = vmul.f32 1.442695, %v5279_v27 }
 0x39a   :  { %v1332_v9 = vpop.permute.xlu1 %1331 }
 0x39b   :  { %10117 = vpow2.f32 %v5288_v28  ;;  %v1347_v36 = vcombine.low %v1324_v19, %v1332_v9  ;;  %v1348_v37 = vcombine.high %v1324_v19, %v1332_v9 }
 0x39c   :  { %v11050_v40 = vpop.eup %10115 }
 0x39d   :  { %v5302_v29 = vsel %vm1619_vm2, %v11050_v40, 0.0  ;;  %v1355_v53 = vrot.slane %v1347_v36, %v10517_v55  ;;  %v1362_v57 = vrot.slane %v1348_v37, %v10517_v55 }
 0x39e   :  { %5303 = vadd.xlane.f32.xlu1 %v5302_v29 }
 0x3a2   :  { %v5262_v31 = vpop.xlane.xlu0 %5261 }
 0x3a3   :  { %v5280_v33 = vsub.f32 %v10997_v30, %v5262_v31 }
 0x3a5   :  { %v5290_v32 = vmul.f32 1.442695, %v5280_v33 }
 0x3a7   :  { %10119 = vpow2.f32 %v5290_v32 }
 0x3a8   :  { %v11055_v25 = vpop.eup %10117 }
 0x3a9   :  { %v5305_v34 = vsel %vm1619_vm2, %v11055_v25, 0.0 }
 0x3aa   :  { %5306 = vadd.xlane.f32.xlu1 %v5305_v34 }
 0x3ae   :  { %v5265_v46 = vpop.xlane.xlu0 %5264 }
 0x3af   :  { %v5281_v35 = vsub.f32 %v11006_v54, %v5265_v46 }
 0x3b1   :  { %v5292_v44 = vmul.f32 1.442695, %v5281_v35 }
 0x3b2   :  { %v1336_v24 = vpop.permute.xlu0 %1335 }
 0x3b3   :  { %10121 = vpow2.f32 %v5292_v44  ;;  %v1363_v47 = vcombine.low %v1328_v23, %v1336_v24  ;;  %v1364_v52 = vcombine.high %v1328_v23, %v1336_v24 }
 0x3b4   :  { %v11060_v30 = vpop.eup %10119 }
 0x3b5   :  { %v1371_v58 = vrot.slane %v1363_v47, %v10517_v55  ;;  %v1378_v51 = vrot.slane %v1364_v52, %v10517_v55  ;;  %v5308_v54 = vsel %vm1619_vm2, %v11060_v30, 0.0 }
 0x3b6   :  { %5309 = vadd.xlane.f32.xlu0 %v5308_v54 }
 0x3b7   :  { %v1379_v20 = vcombine.low %v1355_v53, %v1371_v58  ;;  %v1380_v59 = vcombine.high %v1355_v53, %v1371_v58  ;;  %v1395_v38 = vcombine.low %v1362_v57, %v1378_v51  ;;  %v1396_v56 = vcombine.high %v1362_v57, %v1378_v51 }
 0x3b9   :  { %v1387_v60 = vrot.slane %v1379_v20, %v10519_v62  ;;  %v1394_v61 = vrot.slane %v1380_v59, %v10519_v62  ;;  %v1403_v0 = vrot.slane %v1395_v38, %v10519_v62  ;;  %v1410_v39 = vrot.slane %v1396_v56, %v10519_v62 }
 0x3bb   :  { %v1483_v2 = vcombine.low %v1387_v60, %v1394_v61  ;;  %v9284_v4 = vcombine.high %v1387_v60, %v1394_v61  ;;  %v1499_v5 = vcombine.low %v1403_v0, %v1410_v39  ;;  %v9285_v6 = vcombine.high %v1403_v0, %v1410_v39 }
 0x3bd   :  { %v1490_v1 = vrot.slane %v1483_v2, %v10517_v55  ;;  %v1498_v3 = vrot.slane %v9284_v4, %v10517_v55  ;;  %v1506_v49 = vrot.slane %v1499_v5, %v10517_v55  ;;  %v1514_v7 = vrot.slane %v9285_v6, %v10517_v55 }
 0x3bf   :  { %v1516_v48 = vcombine.high %v1490_v1, %v1498_v3  ;;  %v1532_v10 = vcombine.high %v1506_v49, %v1514_v7  ;;  %v1515_v11 = vcombine.low %v1490_v1, %v1498_v3  ;;  %v1531_v12 = vcombine.low %v1506_v49, %v1514_v7 }
 0x3c0   :  { %v11076_v13 = vpop.eup %10121 }
 0x3c1   :  { %v1530_v14 = vrot.slane %v1516_v48, %v10519_v62  ;;  %v1546_v15 = vrot.slane %v1532_v10, %v10519_v62  ;;  %v5311_v17 = vsel %vm1619_vm2, %v11076_v13, 0.0  ;;  %v1523_v18 = vrot.slane %v1515_v11, %v10519_v62 }
 0x3c2   :  { %5312 = vadd.xlane.f32.xlu0 %v5311_v17  ;;  %v1539_v19 = vrot.slane %v1531_v12, %v10519_v62 }
 0x3c3   :  { %v11084_v8 = vcombine.low %v1530_v14, %v1546_v15  ;;  %v11086_v21 = vcombine.high %v1530_v14, %v1546_v15 }
 0x3c4   :  { %v1547_v22 = vcombine.low %v1523_v18, %v1539_v19  ;;  %v1548_v23 = vcombine.high %v1523_v18, %v1539_v19 }
 0x3c5   :  { %v11141_v5 = vand.u32 4294901760, %v11084_v8  ;;  %v11173_v18 = vand.u32 4294901760, %v11086_v21 }
 0x3c6   :  { %v11088_v26 = vand.u32 4294901760, %v1547_v22  ;;  %v5825_v20 = vand.u32 4294901760, %v1548_v23 }
 0x3c7   :  { %v11150_v10 = vsub.f32 %v11084_v8, %v11141_v5 }
 0x3c8   :  { %9857 = vmatpush3.msra.mxu0 %v11088_v26  ;;  %v11092_v27 = vsub.f32 %v1547_v22, %v11088_v26 }
 0x3c9   :  { %9866 = vmatprep.subr.mxu0 %v10287_v41 }
 0x3ca   :  { %v5454_v28 = vand.u32 4294901760, %v11092_v27 }
 0x3cb   :  { %v5268_v29 = vpop.xlane.xlu1 %5267 }
 0x3cc   :  { %v5282_v31 = vsub.f32 %v11015_v50, %v5268_v29  ;;  %v5455_v33 = vsub.f32 %v11092_v27, %v5454_v28 }
 0x3ce   :  { %v5294_v32 = vmul.f32 1.442695, %v5282_v31  ;;  %v5456_v34 = vand.u32 4294901760, %v5455_v33 }
 0x3d0   :  { %10123 = vpow2.f32 %v5294_v32  ;;  %9862 = vmatpush3.msra.mxu1 %v5456_v34 }
 0x3d1   :  { %9871 = vmatprep.subr.mxu1 %v10287_v41 }
 0x3d2   :  { %v5274_v9 = vpop.xlane.xlu1 %5273 }
 0x3d3   :  { %v5284_v35 = vsub.f32 %v11029_v63, %v5274_v9 }
 0x3d5   :  { %v5298_v36 = vmul.f32 1.442695, %v5284_v35 }
 0x3d6   :  { %v11124_v51 = vpop.permute.xlu1 %1329 }
 0x3d7   :  { %10125 = vpow2.f32 %v5298_v36 }
 0x3d8   :  { %1337 = vrot.lane.b32.xlu0 %v10500_v42, %s10288_s20 }
 0x3dd   :  { %v11103_v46 = vpop.eup %10123 }
 0x3de   :  { %v5314_v50 = vsel %vm1619_vm2, %v11103_v46, 0.0 }
 0x3df   :  { %5315 = vadd.xlane.f32.xlu1 %v5314_v50 }
 0x3e3   :  { %v5271_v37 = vpop.xlane.xlu0 %5270 }
 0x3e4   :  { %v11111_v42 = vpop.eup %10125  ;;  %v5283_v57 = vsub.f32 %v11020_v45, %v5271_v37  ;;  %v11127_v45 = vsub.f32 %v1548_v23, %v5825_v20 }
 0x3e5   :  { %v5320_v63 = vsel %vm1619_vm2, %v11111_v42, 0.0 }
 0x3e6   :  { %v5903_v0 = vand.u32 4294901760, %v11127_v45 }
 0x3e7   :  { %v5277_v44 = vpop.xlane.xlu0 %5276 }
 0x3e8   :  { %v5285_v24 = vsub.f32 %v11036_v16, %v5277_v44  ;;  %v5296_v16 = vmul.f32 1.442695, %v5283_v57 }
 0x3ea   :  { %v5300_v47 = vmul.f32 1.442695, %v5285_v24 }
 0x3eb   :  { %v11131_v39 = vpop.permute.xlu0 %1325 }
 0x3ec   :  { %10127 = vpow2.f32 %v5300_v47 }
 0x3ed   :  { %10129 = vpow2.f32 %v5296_v16 }
 0x3f0   :  { %1333 = vrot.lane.b32.xlu1 %v10502_v43, %s10288_s20 }
 0x3f7   :  { %5321 = vadd.xlane.f32.xlu0 %v5320_v63 }
 0x3f9   :  { %v11115_v52 = vpop.eup %10127 }
 0x3fa   :  { %v5323_v53 = vsel %vm1619_vm2, %v11115_v52, 0.0  ;;  %v11120_v58 = vpop.eup %10129 }
 0x3fb   :  { %5324 = vadd.xlane.f32.xlu0 %v5323_v53  ;;  %v5317_v43 = vsel %vm1619_vm2, %v11120_v58, 0.0 }
 0x414   :  { %5318 = vadd.xlane.f32.xlu1 %v5317_v43 }
 0x427   :  { %v5304_v54 = vpop.xlane.xlu1 %5303 }
 0x428   :  { %10131 = vrcp.f32 %v5304_v54 }
 0x433   :  { %v5307_v59 = vpop.xlane.xlu1 %5306 }
 0x434   :  { %10133 = vrcp.f32 %v5307_v59 }
 0x435   :  { %v10132_v38 = vpop.eup %10131 }
 0x436   :  { %v5327_v56 = vmul.f32 %v10132_v38, %v11050_v40  ;;  %v5904_v40 = vsub.f32 %v11127_v45, %v5903_v0 }
 0x438   :  { %v5343_v60 = vsel %vm1619_vm2, %v5327_v56, 0  ;;  %v5905_v7 = vand.u32 4294901760, %v5904_v40 }
 0x439   :  { %v5411_v61 = vand.u32 4294901760, %v5343_v60 }
 0x43b   :  { %v5412_v2 = vsub.f32 %v5343_v60, %v5411_v61  ;;  %9864 = vmatmul.mubr.f32.vlgmr.msra.gmra.mxu1 %v5411_v61 }
 0x43c   :  { %9872 = vmatpush3.msra.mxu1 %v11088_v26  ;;  %9873 = vmatprep.mubr.msk.f32.mxu1 %vm10289_vm1, %v10287_v41 }
 0x43d   :  { %9881 = vmatprep.subr.mxu1 %v10287_v41  ;;  %v5413_v4 = vand.u32 4294901760, %v5412_v2 }
 0x43f   :  { %9874 = vmatmul.mubr.f32.vlgmr.msra.gmra.mxu1 %v5413_v4  ;;  %v5310_v6 = vpop.xlane.xlu0 %5309  ;;  %v5414_v1 = vsub.f32 %v5412_v2, %v5413_v4 }
 0x440   :  { %9882 = vmatpush3.msra.mxu1 %v11088_v26  ;;  %10135 = vrcp.f32 %v5310_v6  ;;  %9883 = vmatprep.mubr.msk.f32.mxu1 %vm10289_vm1, %v10287_v41 }
 0x441   :  { %v10134_v3 = vpop.eup %10133  ;;  %9891 = vmatprep.subr.mxu1 %v10287_v41  ;;  %v5415_v49 = vand.u32 4294901760, %v5414_v1 }
 0x442   :  { %v5329_v48 = vmul.f32 %v10134_v3, %v11055_v25  ;;  %v6352_v25 = vand.u32 4294901760, %v11150_v10 }
 0x443   :  { %9859 = vmatmul.mubr.f32.vlgmr.msra.gmra.mxu0 %v5415_v49  ;;  %9884 = vmatmul.mubr.f32.vlgmr.msra.gmra.mxu1 %v5411_v61 }
 0x444   :  { %9867 = vmatpush3.msra.mxu0 %v11092_v27  ;;  %9892 = vmatpush3.msra.mxu1 %v5905_v7  ;;  %v5792_v11 = vsel %vm1619_vm2, %v5329_v48, 0  ;;  %v6353_v17 = vsub.f32 %v11150_v10, %v6352_v25 }
 0x445   :  { %9868 = vmatprep.mubr.msk.f32.mxu0 %vm10289_vm1, %v10287_v41  ;;  %9876 = vmatprep.subr.mxu0 %v10287_v41  ;;  %v5860_v12 = vand.u32 4294901760, %v5792_v11 }
 0x446   :  { %9893 = vmatprep.mubr.msk.f32.mxu1 %vm10289_vm1, %v10287_v41  ;;  %9901 = vmatprep.subr.mxu1 %v10287_v41  ;;  %v6354_v26 = vand.u32 4294901760, %v6353_v17 }
 0x447   :  { %9869 = vmatmul.mubr.f32.vlgmr.msra.gmra.mxu0 %v5412_v2  ;;  %v5861_v14 = vsub.f32 %v5792_v11, %v5860_v12  ;;  %9894 = vmatmul.mubr.f32.vlgmr.msra.gmra.mxu1 %v5860_v12 }
 0x448   :  { %9877 = vmatpush3.msra.mxu0 %v5454_v28  ;;  %9902 = vmatpush3.msra.mxu1 %v5825_v20  ;;  %v11184_v28 = vsub.f32 %v11086_v21, %v11173_v18 }
 0x449   :  { %9878 = vmatprep.mubr.msk.f32.mxu0 %vm10289_vm1, %v10287_v41  ;;  %9886 = vmatprep.subr.mxu0 %v10287_v41  ;;  %v5862_v15 = vand.u32 4294901760, %v5861_v14 }
 0x44a   :  { %9903 = vmatprep.mubr.msk.f32.mxu1 %vm10289_vm1, %v10287_v41  ;;  %9911 = vmatprep.subr.mxu1 %v10287_v41 }
 0x44b   :  { %9879 = vmatmul.mubr.f32.vlgmr.msra.gmra.mxu0 %v5411_v61  ;;  %9904 = vmatmul.mubr.f32.vlgmr.msra.gmra.mxu1 %v5862_v15  ;;  %v5313_v19 = vpop.xlane.xlu0 %5312  ;;  %v5863_v8 = vsub.f32 %v5861_v14, %v5862_v15 }
 0x44c   :  { %9887 = vmatpush3.msra.mxu0 %v5825_v20  ;;  %9912 = vmatpush3.msra.mxu1 %v5825_v20  ;;  %10137 = vrcp.f32 %v5313_v19 }
 0x44d   :  { %v10136_v22 = vpop.eup %10135  ;;  %9888 = vmatprep.mubr.msk.f32.mxu0 %vm10289_vm1, %v10287_v41  ;;  %9896 = vmatprep.subr.mxu0 %v10287_v41  ;;  %v5864_v23 = vand.u32 4294901760, %v5863_v8 }
 0x44e   :  { %9913 = vmatprep.mubr.msk.f32.mxu1 %vm10289_vm1, %v10287_v41  ;;  %9921 = vmatprep.subr.mxu1 %v10287_v41  ;;  %v5331_v27 = vmul.f32 %v10136_v22, %v11060_v30  ;;  %v6801_v30 = vand.u32 4294901760, %v11184_v28 }
 0x44f   :  { %9889 = vmatmul.mubr.f32.vlgmr.msra.gmra.mxu0 %v5864_v23  ;;  %9914 = vmatmul.mubr.f32.vlgmr.msra.gmra.mxu1 %v5860_v12  ;;  %v1338_v53 = vpop.permute.xlu0 %1337 }
 0x450   :  { %9897 = vmatpush3.msra.mxu0 %v11127_v45  ;;  %9922 = vmatpush3.msra.mxu1 %v6354_v26  ;;  %v6241_v29 = vsel %vm1619_vm2, %v5331_v27, 0  ;;  %v6802_v32 = vsub.f32 %v11184_v28, %v6801_v30  ;;  %v1431_v16 = vcombine.low %v11124_v51, %v1338_v53  ;;  %v1432_v43 = vcombine.high %v11124_v51, %v1338_v53 }
 0x451   :  { %9898 = vmatprep.mubr.msk.f32.mxu0 %vm10289_vm1, %v10287_v41  ;;  %9906 = vmatprep.subr.mxu0 %v10287_v41  ;;  %v6309_v31 = vand.u32 4294901760, %v6241_v29 }
 0x452   :  { %9923 = vmatprep.mubr.msk.f32.mxu1 %vm10289_vm1, %v10287_v41  ;;  %9931 = vmatprep.subr.mxu1 %v10287_v41  ;;  %v6803_v50 = vand.u32 4294901760, %v6802_v32  ;;  %v1439_v38 = vrot.slane %v1431_v16, %v10517_v55  ;;  %v1446_v56 = vrot.slane %v1432_v43, %v10517_v55 }
 0x453   :  { %9899 = vmatmul.mubr.f32.vlgmr.msra.gmra.mxu0 %v5861_v14  ;;  %v6310_v21 = vsub.f32 %v6241_v29, %v6309_v31  ;;  %9924 = vmatmul.mubr.f32.vlgmr.msra.gmra.mxu1 %v6309_v31 }
 0x454   :  { %9907 = vmatpush3.msra.mxu0 %v5903_v0  ;;  %9932 = vmatpush3.msra.mxu1 %v11141_v5 }
 0x455   :  { %9908 = vmatprep.mubr.msk.f32.mxu0 %vm10289_vm1, %v10287_v41  ;;  %9916 = vmatprep.subr.mxu0 %v10287_v41  ;;  %v6311_v33 = vand.u32 4294901760, %v6310_v21 }
 0x456   :  { %9933 = vmatprep.mubr.msk.f32.mxu1 %vm10289_vm1, %v10287_v41  ;;  %9941 = vmatprep.subr.mxu1 %v10287_v41 }
 0x457   :  { %9909 = vmatmul.mubr.f32.vlgmr.msra.gmra.mxu0 %v5860_v12  ;;  %9934 = vmatmul.mubr.f32.vlgmr.msra.gmra.mxu1 %v6311_v33  ;;  %v6312_v34 = vsub.f32 %v6310_v21, %v6311_v33 }
 0x458   :  { %9917 = vmatpush3.msra.mxu0 %v11141_v5  ;;  %9942 = vmatpush3.msra.mxu1 %v11141_v5 }
 0x459   :  { %v10138_v9 = vpop.eup %10137  ;;  %9918 = vmatprep.mubr.msk.f32.mxu0 %vm10289_vm1, %v10287_v41  ;;  %9926 = vmatprep.subr.mxu0 %v10287_v41  ;;  %v6313_v35 = vand.u32 4294901760, %v6312_v34 }
 0x45a   :  { %9943 = vmatprep.mubr.msk.f32.mxu1 %vm10289_vm1, %v10287_v41  ;;  %9951 = vmatprep.subr.mxu1 %v10287_v41  ;;  %v5333_v36 = vmul.f32 %v10138_v9, %v11076_v13 }
 0x45b   :  { %9919 = vmatmul.mubr.f32.vlgmr.msra.gmra.mxu0 %v6313_v35  ;;  %9944 = vmatmul.mubr.f32.vlgmr.msra.gmra.mxu1 %v6309_v31 }
 0x45c   :  { %9927 = vmatpush3.msra.mxu0 %v11150_v10  ;;  %9952 = vmatpush3.msra.mxu1 %v6803_v50  ;;  %v6690_v37 = vsel %vm1619_vm2, %v5333_v36, 0 }
 0x45d   :  { %9928 = vmatprep.mubr.msk.f32.mxu0 %vm10289_vm1, %v10287_v41  ;;  %9936 = vmatprep.subr.mxu0 %v10287_v41  ;;  %v6758_v44 = vand.u32 4294901760, %v6690_v37 }
 0x45e   :  { %9953 = vmatprep.mubr.msk.f32.mxu1 %vm10289_vm1, %v10287_v41  ;;  %9961 = vmatprep.subr.mxu1 %v10287_v41 }
 0x45f   :  { %9929 = vmatmul.mubr.f32.vlgmr.msra.gmra.mxu0 %v6310_v21  ;;  %v6759_v13 = vsub.f32 %v6690_v37, %v6758_v44  ;;  %9954 = vmatmul.mubr.f32.vlgmr.msra.gmra.mxu1 %v6758_v44 }
 0x460   :  { %9937 = vmatpush3.msra.mxu0 %v6352_v25  ;;  %9962 = vmatpush3.msra.mxu1 %v11173_v18 }
 0x461   :  { %9938 = vmatprep.mubr.msk.f32.mxu0 %vm10289_vm1, %v10287_v41  ;;  %9946 = vmatprep.subr.mxu0 %v10287_v41  ;;  %v6760_v24 = vand.u32 4294901760, %v6759_v13 }
 0x462   :  { %9963 = vmatprep.mubr.msk.f32.mxu1 %vm10289_vm1, %v10287_v41  ;;  %9971 = vmatprep.subr.mxu1 %v10287_v41 }
 0x463   :  { %9939 = vmatmul.mubr.f32.vlgmr.msra.gmra.mxu0 %v6309_v31  ;;  %9964 = vmatmul.mubr.f32.vlgmr.msra.gmra.mxu1 %v6760_v24  ;;  %v6761_v47 = vsub.f32 %v6759_v13, %v6760_v24 }
 0x464   :  { %9947 = vmatpush3.msra.mxu0 %v11173_v18  ;;  %9972 = vmatpush3.msra.mxu1 %v11173_v18 }
 0x465   :  { %9948 = vmatprep.mubr.msk.f32.mxu0 %vm10289_vm1, %v10287_v41  ;;  %9956 = vmatprep.subr.mxu0 %v10287_v41  ;;  %v6762_v63 = vand.u32 4294901760, %v6761_v47 }
 0x466   :  { %9973 = vmatprep.mubr.msk.f32.mxu1 %vm10289_vm1, %v10287_v41  ;;  %9981 = vmatprep.subr.mxu1 %v10287_v41 }
 0x467   :  { %9949 = vmatmul.mubr.f32.vlgmr.msra.gmra.mxu0 %v6762_v63  ;;  %9974 = vmatmul.mubr.f32.vlgmr.msra.gmra.mxu1 %v6758_v44 }
 0x468   :  { %9957 = vmatpush3.msra.mxu0 %v11184_v28  ;;  %v5316_v57 = vpop.xlane.xlu1 %5315  ;;  %9958 = vmatprep.mubr.msk.f32.mxu0 %vm10289_vm1, %v10287_v41 }
 0x469   :  { %10139 = vrcp.f32 %v5316_v57  ;;  %9966 = vmatprep.subr.mxu0 %v10287_v41  ;;  %9983 = vmatprep.mubr.msk.f32.mxu1 %vm10289_vm1, %v10287_v41 }
 0x46b   :  { %9959 = vmatmul.mubr.f32.vlgmr.msra.gmra.mxu0 %v6759_v13 }
 0x46c   :  { %9967 = vmatpush3.msra.mxu0 %v6801_v30  ;;  %v1334_v54 = vpop.permute.xlu1 %1333  ;;  %9968 = vmatprep.mubr.msk.f32.mxu0 %vm10289_vm1, %v10287_v41 }
 0x46d   :  { %v1415_v20 = vcombine.low %v11131_v39, %v1334_v54  ;;  %v1416_v59 = vcombine.high %v11131_v39, %v1334_v54  ;;  %9976 = vmatprep.subr.mxu0 %v10287_v41 }
 0x46f   :  { %v1423_v51 = vrot.slane %v1415_v20, %v10517_v55  ;;  %v1430_v45 = vrot.slane %v1416_v59, %v10517_v55  ;;  %9969 = vmatmul.mubr.f32.vlgmr.msra.gmra.mxu0 %v6758_v44 }
 0x470   :  { %9978 = vmatprep.mubr.msk.f32.mxu0 %vm10289_vm1, %v10287_v41 }
 0x471   :  { %v1447_v60 = vcombine.low %v1423_v51, %v1439_v38  ;;  %v1448_v61 = vcombine.high %v1423_v51, %v1439_v38  ;;  %v1463_v0 = vcombine.low %v1430_v45, %v1446_v56  ;;  %v1464_v2 = vcombine.high %v1430_v45, %v1446_v56 }
 0x473   :  { %v1455_v39 = vrot.slane %v1447_v60, %v10519_v62  ;;  %v1462_v4 = vrot.slane %v1448_v61, %v10519_v62  ;;  %v1471_v40 = vrot.slane %v1463_v0, %v10519_v62  ;;  %v1478_v5 = vrot.slane %v1464_v2, %v10519_v62 }
 0x475   :  { %v1551_v6 = vcombine.low %v1455_v39, %v1462_v4  ;;  %v9286_v1 = vcombine.high %v1455_v39, %v1462_v4  ;;  %v1567_v3 = vcombine.low %v1471_v40, %v1478_v5  ;;  %v9287_v49 = vcombine.high %v1471_v40, %v1478_v5 }
 0x476   :  { %v10140_v7 = vpop.eup %10139 }
 0x477   :  { %v5335_v48 = vmul.f32 %v10140_v7, %v11103_v46  ;;  %v1558_v10 = vrot.slane %v1551_v6, %v10517_v55  ;;  %v1566_v11 = vrot.slane %v9286_v1, %v10517_v55  ;;  %v1574_v12 = vrot.slane %v1567_v3, %v10517_v55 }
 0x478   :  { %v1582_v25 = vrot.slane %v9287_v49, %v10517_v55 }
 0x479   :  { %v1583_v14 = vcombine.low %v1558_v10, %v1566_v11  ;;  %v7139_v15 = vsel %vm1619_vm2, %v5335_v48, 0  ;;  %v1584_v37 = vcombine.high %v1558_v10, %v1566_v11 }
 0x47a   :  { %v1599_v17 = vcombine.low %v1574_v12, %v1582_v25  ;;  %v7207_v18 = vand.u32 4294901760, %v7139_v15  ;;  %v1600_v44 = vcombine.high %v1574_v12, %v1582_v25 }
 0x47b   :  { %v1591_v19 = vrot.slane %v1583_v14, %v10519_v62  ;;  %v1598_v24 = vrot.slane %v1584_v37, %v10519_v62 }
 0x47c   :  { %v1607_v8 = vrot.slane %v1599_v17, %v10519_v62  ;;  %v7208_v22 = vsub.f32 %v7139_v15, %v7207_v18  ;;  %v1614_v47 = vrot.slane %v1600_v44, %v10519_v62 }
 0x47e   :  { %v1615_v23 = vcombine.low %v1591_v19, %v1607_v8  ;;  %v7209_v46 = vand.u32 4294901760, %v7208_v22  ;;  %v1616_v26 = vcombine.high %v1591_v19, %v1607_v8  ;;  %v1617_v63 = vcombine.low %v1598_v24, %v1614_v47 }
 0x47f   :  { %v1618_v60 = vcombine.high %v1598_v24, %v1614_v47 }
 0x480   :  { %v7172_v27 = vand.u32 4294901760, %v1615_v23  ;;  %v7210_v28 = vsub.f32 %v7208_v22, %v7209_v46  ;;  %v11274_v30 = vand.u32 4294901760, %v1616_v26  ;;  %v5322_v36 = vpop.xlane.xlu0 %5321  ;;  %v8070_v57 = vand.u32 4294901760, %v1617_v63 }
 0x481   :  { %10141 = vrcp.f32 %v5322_v36  ;;  %v11322_v2 = vand.u32 4294901760, %v1618_v60 }
 0x482   :  { %9977 = vmatpush3.msra.mxu0 %v7172_v27  ;;  %v7211_v29 = vand.u32 4294901760, %v7210_v28  ;;  %v7249_v31 = vsub.f32 %v1615_v23, %v7172_v27  ;;  %v11281_v32 = vsub.f32 %v1616_v26, %v11274_v30  ;;  %v11307_v20 = vsub.f32 %v1617_v63, %v8070_v57 }
 0x483   :  { %9986 = vmatprep.subr.mxu0 %v10287_v41  ;;  %v11330_v1 = vsub.f32 %v1618_v60, %v11322_v2 }
 0x484   :  { %9979 = vmatmul.mubr.f32.vlgmr.msra.gmra.mxu0 %v7211_v29  ;;  %v7250_v21 = vand.u32 4294901760, %v7249_v31  ;;  %v7699_v9 = vand.u32 4294901760, %v11281_v32  ;;  %v5325_v53 = vpop.xlane.xlu0 %5324  ;;  %v8148_v51 = vand.u32 4294901760, %v11307_v20 }
 0x485   :  { %9987 = vmatpush3.msra.mxu0 %v7249_v31  ;;  %9988 = vmatprep.mubr.msk.f32.mxu0 %vm10289_vm1, %v10287_v41  ;;  %v8597_v7 = vand.u32 4294901760, %v11330_v1 }
 0x486   :  { %9996 = vmatprep.subr.mxu0 %v10287_v41  ;;  %v7251_v33 = vsub.f32 %v7249_v31, %v7250_v21  ;;  %v7700_v35 = vsub.f32 %v11281_v32, %v7699_v9 }
 0x487   :  { %v8598_v11 = vsub.f32 %v11330_v1, %v8597_v7 }
 0x488   :  { %9989 = vmatmul.mubr.f32.vlgmr.msra.gmra.mxu0 %v7208_v22  ;;  %v7252_v34 = vand.u32 4294901760, %v7251_v33  ;;  %v7701_v50 = vand.u32 4294901760, %v7700_v35 }
 0x489   :  { %9997 = vmatpush3.msra.mxu0 %v7250_v21  ;;  %9998 = vmatprep.mubr.msk.f32.mxu0 %vm10289_vm1, %v10287_v41  ;;  %v8599_v14 = vand.u32 4294901760, %v8598_v11 }
 0x48a   :  { %9982 = vmatpush3.msra.mxu1 %v7252_v34  ;;  %10006 = vmatprep.subr.mxu0 %v10287_v41 }
 0x48b   :  { %9984 = vmatmul.mubr.f32.vlgmr.msra.gmra.mxu1 %v7207_v18  ;;  %9991 = vmatprep.subr.mxu1 %v10287_v41 }
 0x48c   :  { %9992 = vmatpush3.msra.mxu1 %v7172_v27  ;;  %9999 = vmatmul.mubr.f32.vlgmr.msra.gmra.mxu0 %v7207_v18 }
 0x48d   :  { %10007 = vmatpush3.msra.mxu0 %v11274_v30  ;;  %9993 = vmatprep.mubr.msk.f32.mxu1 %vm10289_vm1, %v10287_v41 }
 0x48e   :  { %10001 = vmatprep.subr.mxu1 %v10287_v41  ;;  %10008 = vmatprep.mubr.msk.f32.mxu0 %vm10289_vm1, %v10287_v41  ;;  %v10142_v16 = vpop.eup %10141 }
 0x48f   :  { %9994 = vmatmul.mubr.f32.vlgmr.msra.gmra.mxu1 %v7209_v46  ;;  %10016 = vmatprep.subr.mxu0 %v10287_v41  ;;  %v5339_v59 = vmul.f32 %v10142_v16, %v11111_v42  ;;  %v8149_v42 = vsub.f32 %v11307_v20, %v8148_v51 }
 0x490   :  { %10002 = vmatpush3.msra.mxu1 %v7172_v27  ;;  %10003 = vmatprep.mubr.msk.f32.mxu1 %vm10289_vm1, %v10287_v41 }
 0x491   :  { %10011 = vmatprep.subr.mxu1 %v10287_v41  ;;  %v8037_v45 = vsel %vm1619_vm2, %v5339_v59, 0  ;;  %v8150_v6 = vand.u32 4294901760, %v8149_v42 }
 0x492   :  { %v11317_v0 = vand.u32 4294901760, %v8037_v45 }
 0x493   :  { %10004 = vmatmul.mubr.f32.vlgmr.msra.gmra.mxu1 %v7207_v18 }
 0x494   :  { %10012 = vmatpush3.msra.mxu1 %v7701_v50  ;;  %10013 = vmatprep.mubr.msk.f32.mxu1 %vm10289_vm1, %v10287_v41  ;;  %v8106_v5 = vsub.f32 %v8037_v45, %v11317_v0 }
 0x495   :  { %10021 = vmatprep.subr.mxu1 %v10287_v41 }
 0x496   :  { %v8107_v49 = vand.u32 4294901760, %v8106_v5 }
 0x498   :  { %v8108_v48 = vsub.f32 %v8106_v5, %v8107_v49 }
 0x49a   :  { %v8109_v12 = vand.u32 4294901760, %v8108_v48 }
 0x49d   :  { %v5319_v13 = vpop.xlane.xlu1 %5318 }
 0x49e   :  { %10143 = vrcp.f32 %v5319_v13 }
 0x49f   :  { %10145 = vrcp.f32 %v5325_v53 }
 0x4ab   :  { %v10144_v43 = vpop.eup %10143 }
 0x4ac   :  { %v5337_v54 = vmul.f32 %v10144_v43, %v11120_v58  ;;  %v10146_v39 = vpop.eup %10145 }
 0x4ad   :  { %v5341_v3 = vmul.f32 %v10146_v39, %v11115_v52 }
 0x4ae   :  { %v7588_v38 = vsel %vm1619_vm2, %v5337_v54, 0 }
 0x4af   :  { %v7656_v56 = vand.u32 4294901760, %v7588_v38  ;;  %v8486_v52 = vsel %vm1619_vm2, %v5341_v3, 0 }
 0x4b0   :  { %v8554_v10 = vand.u32 4294901760, %v8486_v52 }
 0x4b1   :  { %v7657_v61 = vsub.f32 %v7588_v38, %v7656_v56  ;;  %10014 = vmatmul.mubr.f32.vlgmr.msra.gmra.mxu1 %v7656_v56 }
 0x4b2   :  { %10022 = vmatpush3.msra.mxu1 %v11274_v30  ;;  %10023 = vmatprep.mubr.msk.f32.mxu1 %vm10289_vm1, %v10287_v41  ;;  %v8555_v25 = vsub.f32 %v8486_v52, %v8554_v10 }
 0x4b3   :  { %10031 = vmatprep.subr.mxu1 %v10287_v41  ;;  %v7658_v58 = vand.u32 4294901760, %v7657_v61 }
 0x4b4   :  { %v8556_v15 = vand.u32 4294901760, %v8555_v25 }
 0x4b5   :  { %10024 = vmatmul.mubr.f32.vlgmr.msra.gmra.mxu1 %v7658_v58  ;;  %v7659_v4 = vsub.f32 %v7657_v61, %v7658_v58 }
 0x4b6   :  { %10032 = vmatpush3.msra.mxu1 %v11274_v30  ;;  %10033 = vmatprep.mubr.msk.f32.mxu1 %vm10289_vm1, %v10287_v41  ;;  %v8557_v17 = vsub.f32 %v8555_v25, %v8556_v15 }
 0x4b7   :  { %10041 = vmatprep.subr.mxu1 %v10287_v41  ;;  %v7660_v40 = vand.u32 4294901760, %v7659_v4 }
 0x4b8   :  { %v8558_v18 = vand.u32 4294901760, %v8557_v17 }
 0x4b9   :  { %10009 = vmatmul.mubr.f32.vlgmr.msra.gmra.mxu0 %v7660_v40  ;;  %10034 = vmatmul.mubr.f32.vlgmr.msra.gmra.mxu1 %v7656_v56 }
 0x4ba   :  { %10017 = vmatpush3.msra.mxu0 %v11281_v32  ;;  %10042 = vmatpush3.msra.mxu1 %v8150_v6 }
 0x4bb   :  { %10018 = vmatprep.mubr.msk.f32.mxu0 %vm10289_vm1, %v10287_v41  ;;  %10026 = vmatprep.subr.mxu0 %v10287_v41 }
 0x4bc   :  { %10043 = vmatprep.mubr.msk.f32.mxu1 %vm10289_vm1, %v10287_v41  ;;  %10051 = vmatprep.subr.mxu1 %v10287_v41 }
 0x4bd   :  { %10019 = vmatmul.mubr.f32.vlgmr.msra.gmra.mxu0 %v7657_v61  ;;  %10044 = vmatmul.mubr.f32.vlgmr.msra.gmra.mxu1 %v11317_v0 }
 0x4be   :  { %10027 = vmatpush3.msra.mxu0 %v7699_v9  ;;  %10052 = vmatpush3.msra.mxu1 %v8070_v57 }
 0x4bf   :  { %10028 = vmatprep.mubr.msk.f32.mxu0 %vm10289_vm1, %v10287_v41  ;;  %10036 = vmatprep.subr.mxu0 %v10287_v41 }
 0x4c0   :  { %10053 = vmatprep.mubr.msk.f32.mxu1 %vm10289_vm1, %v10287_v41  ;;  %10061 = vmatprep.subr.mxu1 %v10287_v41 }
 0x4c1   :  { %10029 = vmatmul.mubr.f32.vlgmr.msra.gmra.mxu0 %v7656_v56  ;;  %10054 = vmatmul.mubr.f32.vlgmr.msra.gmra.mxu1 %v8107_v49 }
 0x4c2   :  { %10037 = vmatpush3.msra.mxu0 %v8070_v57  ;;  %10062 = vmatpush3.msra.mxu1 %v8070_v57 }
 0x4c3   :  { %10038 = vmatprep.mubr.msk.f32.mxu0 %vm10289_vm1, %v10287_v41  ;;  %10046 = vmatprep.subr.mxu0 %v10287_v41 }
 0x4c4   :  { %10063 = vmatprep.mubr.msk.f32.mxu1 %vm10289_vm1, %v10287_v41  ;;  %10071 = vmatprep.subr.mxu1 %v10287_v41 }
 0x4c5   :  { %10039 = vmatmul.mubr.f32.vlgmr.msra.gmra.mxu0 %v8109_v12  ;;  %10064 = vmatmul.mubr.f32.vlgmr.msra.gmra.mxu1 %v11317_v0 }
 0x4c6   :  { %10047 = vmatpush3.msra.mxu0 %v11307_v20  ;;  %10072 = vmatpush3.msra.mxu1 %v8599_v14 }
 0x4c7   :  { %10048 = vmatprep.mubr.msk.f32.mxu0 %vm10289_vm1, %v10287_v41  ;;  %10056 = vmatprep.subr.mxu0 %v10287_v41 }
 0x4c8   :  { %10073 = vmatprep.mubr.msk.f32.mxu1 %vm10289_vm1, %v10287_v41  ;;  %10081 = vmatprep.subr.mxu1 %v10287_v41 }
 0x4c9   :  { %10049 = vmatmul.mubr.f32.vlgmr.msra.gmra.mxu0 %v8106_v5  ;;  %10074 = vmatmul.mubr.f32.vlgmr.msra.gmra.mxu1 %v8554_v10 }
 0x4ca   :  { %10057 = vmatpush3.msra.mxu0 %v8148_v51  ;;  %10082 = vmatpush3.msra.mxu1 %v11322_v2 }
 0x4cb   :  { %10058 = vmatprep.mubr.msk.f32.mxu0 %vm10289_vm1, %v10287_v41  ;;  %10066 = vmatprep.subr.mxu0 %v10287_v41 }
 0x4cc   :  { %10083 = vmatprep.mubr.msk.f32.mxu1 %vm10289_vm1, %v10287_v41  ;;  %10091 = vmatprep.subr.mxu1 %v10287_v41 }
 0x4cd   :  { %10059 = vmatmul.mubr.f32.vlgmr.msra.gmra.mxu0 %v11317_v0  ;;  %10084 = vmatmul.mubr.f32.vlgmr.msra.gmra.mxu1 %v8556_v15 }
 0x4ce   :  { %10067 = vmatpush3.msra.mxu0 %v11322_v2  ;;  %10092 = vmatpush3.msra.mxu1 %v11322_v2 }
 0x4cf   :  { %10068 = vmatprep.mubr.msk.f32.mxu0 %vm10289_vm1, %v10287_v41  ;;  %10076 = vmatprep.subr.mxu0 %v10287_v41 }
 0x4d0   :  { %10093 = vmatprep.mubr.msk.f32.mxu1 %vm10289_vm1, %v10287_v41 }
 0x4d1   :  { %10069 = vmatmul.mubr.f32.vlgmr.msra.gmra.mxu0 %v8558_v18  ;;  %10094 = vmatmul.mubr.f32.vlgmr.msra.gmra.mxu1 %v8554_v10 }
 0x4d2   :  { %10077 = vmatpush3.msra.mxu0 %v11330_v1  ;;  %10078 = vmatprep.mubr.msk.f32.mxu0 %vm10289_vm1, %v10287_v41 }
 0x4d3   :  { %10086 = vmatprep.subr.mxu0 %v10287_v41 }
 0x4d5   :  { %10079 = vmatmul.mubr.f32.vlgmr.msra.gmra.mxu0 %v8555_v25 }
 0x4d6   :  { %10087 = vmatpush3.msra.mxu0 %v8597_v7  ;;  %10088 = vmatprep.mubr.msk.f32.mxu0 %vm10289_vm1, %v10287_v41 }
 0x4d9   :  { %10089 = vmatmul.mubr.f32.vlgmr.msra.gmra.mxu0 %v8554_v10 }
 0x4fb   :  { %v5493_v19 = vpop.f32.mrf.mxu1 }
 0x4fd   :  { %v9865_v8 = vpop.f32.mrf.mxu1 }
 0x4ff   :  { %v5641_v22 = vpop.f32.mrf.mxu1 }
 0x501   :  { %v9875_v23 = vpop.f32.mrf.mxu1 }
 0x503   :  { %v5417_v46 = vpop.f32.mrf.mxu0  ;;  %v5787_v26 = vpop.f32.mrf.mxu1 }
 0x504   :  { %v5494_v60 = vadd.f32 %v5493_v19, %v5417_v46 }
 0x505   :  { %v9860_v27 = vpop.f32.mrf.mxu0  ;;  %v9885_v28 = vpop.f32.mrf.mxu1 }
 0x507   :  { %v5567_v29 = vpop.f32.mrf.mxu0  ;;  %v5942_v31 = vpop.f32.mrf.mxu1 }
 0x508   :  { %v5568_v42 = vadd.f32 %v5567_v29, %v5494_v60 }
 0x509   :  { %v9870_v30 = vpop.f32.mrf.mxu0  ;;  %v9895_v21 = vpop.f32.mrf.mxu1 }
 0x50a   :  { %v5642_v3 = vadd.f32 %v5641_v22, %v5568_v42 }
 0x50b   :  { %v5715_v33 = vpop.f32.mrf.mxu0  ;;  %v6090_v32 = vpop.f32.mrf.mxu1 }
 0x50c   :  { %v5716_v12 = vadd.f32 %v5715_v33, %v5642_v3 }
 0x50d   :  { %v9880_v34 = vpop.f32.mrf.mxu0  ;;  %v9905_v9 = vpop.f32.mrf.mxu1 }
 0x50e   :  { %v5788_v8 = vadd.f32 %v5787_v26, %v5716_v12 }
 0x50f   :  { %v5866_v35 = vpop.f32.mrf.mxu0  ;;  %v6236_v50 = vpop.f32.mrf.mxu1 }
 0x510   :  { %v5943_v2 = vadd.f32 %v5942_v31, %v5866_v35 }
 0x511   :  { %v9890_v41 = vpop.f32.mrf.mxu0  ;;  %v9915_v36 = vpop.f32.mrf.mxu1 }
 0x513   :  { %v6016_v37 = vpop.f32.mrf.mxu0  ;;  %v6391_v44 = vpop.f32.mrf.mxu1 }
 0x514   :  { %v6017_v40 = vadd.f32 %v6016_v37, %v5943_v2 }
 0x515   :  { %v9900_v13 = vpop.f32.mrf.mxu0  ;;  %v9925_v24 = vpop.f32.mrf.mxu1 }
 0x516   :  { %v6091_v52 = vadd.f32 %v6090_v32, %v6017_v40 }
 0x517   :  { %v6164_v47 = vpop.f32.mrf.mxu0  ;;  %v6539_v63 = vpop.f32.mrf.mxu1 }
 0x518   :  { %v6165_v15 = vadd.f32 %v6164_v47, %v6091_v52 }
 0x519   :  { %v9910_v53 = vpop.f32.mrf.mxu0  ;;  %v9935_v57 = vpop.f32.mrf.mxu1 }
 0x51a   :  { %v6237_v27 = vadd.f32 %v6236_v50, %v6165_v15 }
 0x51b   :  { %v6315_v16 = vpop.f32.mrf.mxu0  ;;  %v6685_v43 = vpop.f32.mrf.mxu1 }
 0x51c   :  { %v6392_v56 = vadd.f32 %v6391_v44, %v6315_v16 }
 0x51d   :  { %v9920_v54 = vpop.f32.mrf.mxu0  ;;  %v9945_v20 = vpop.f32.mrf.mxu1 }
 0x51f   :  { %v6465_v59 = vpop.f32.mrf.mxu0  ;;  %v6840_v38 = vpop.f32.mrf.mxu1 }
 0x520   :  { %v6466_v61 = vadd.f32 %v6465_v59, %v6392_v56 }
 0x521   :  { %v9930_v51 = vpop.f32.mrf.mxu0  ;;  %v9955_v45 = vpop.f32.mrf.mxu1 }
 0x522   :  { %v6540_v5 = vadd.f32 %v6539_v63, %v6466_v61 }
 0x523   :  { %v6613_v58 = vpop.f32.mrf.mxu0  ;;  %v6988_v0 = vpop.f32.mrf.mxu1 }
 0x524   :  { %v6614_v48 = vadd.f32 %v6613_v58, %v6540_v5 }
 0x525   :  { %v9940_v39 = vpop.f32.mrf.mxu0  ;;  %v9965_v4 = vpop.f32.mrf.mxu1 }
 0x526   :  { %v6686_v17 = vadd.f32 %v6685_v43, %v6614_v48 }
 0x527   :  { %v6764_v6 = vpop.f32.mrf.mxu0  ;;  %v7134_v1 = vpop.f32.mrf.mxu1 }
 0x528   :  { %v6841_v10 = vadd.f32 %v6840_v38, %v6764_v6  ;;  %v8934_v28 = vcombine.low %v5788_v8, %v6686_v17  ;;  %v8935_v29 = vcombine.high %v5788_v8, %v6686_v17 }
 0x529   :  { %v9950_v49 = vpop.f32.mrf.mxu0  ;;  %v9975_v7 = vpop.f32.mrf.mxu1 }
 0x52a   :  { %v8942_v21 = vrot.slane %v8934_v28, %v10517_v55  ;;  %v8949_v32 = vrot.slane %v8935_v29, %v10517_v55 }
 0x52b   :  { %v6914_v11 = vpop.f32.mrf.mxu0 }
 0x52c   :  { %v6915_v25 = vadd.f32 %v6914_v11, %v6841_v10 }
 0x52d   :  { %v9960_v14 = vpop.f32.mrf.mxu0 }
 0x52e   :  { %v6989_v18 = vadd.f32 %v6988_v0, %v6915_v25 }
 0x52f   :  { %v7062_v19 = vpop.f32.mrf.mxu0 }
 0x530   :  { %v7063_v23 = vadd.f32 %v7062_v19, %v6989_v18 }
 0x531   :  { %v9970_v46 = vpop.f32.mrf.mxu0 }
 0x532   :  { %v7135_v22 = vadd.f32 %v7134_v1, %v7063_v23 }
 0x534   :  { %v8950_v31 = vcombine.low %v6237_v27, %v7135_v22  ;;  %v8951_v30 = vcombine.high %v6237_v27, %v7135_v22 }
 0x536   :  { %v8958_v33 = vrot.slane %v8950_v31, %v10517_v55  ;;  %v8965_v34 = vrot.slane %v8951_v30, %v10517_v55 }
 0x538   :  { %v8966_v9 = vcombine.low %v8942_v21, %v8958_v33  ;;  %v8967_v35 = vcombine.high %v8942_v21, %v8958_v33  ;;  %v8982_v41 = vcombine.low %v8949_v32, %v8965_v34  ;;  %v8983_v26 = vcombine.high %v8949_v32, %v8965_v34 }
 0x53a   :  { %v8974_v36 = vrot.slane %v8966_v9, %v10519_v62  ;;  %v8981_v50 = vrot.slane %v8967_v35, %v10519_v62  ;;  %v8990_v37 = vrot.slane %v8982_v41, %v10519_v62  ;;  %v8997_v44 = vrot.slane %v8983_v26, %v10519_v62 }
 0x53c   :  { %v9070_v13 = vcombine.low %v8974_v36, %v8981_v50  ;;  %v9288_v24 = vcombine.high %v8974_v36, %v8981_v50  ;;  %v9086_v47 = vcombine.low %v8990_v37, %v8997_v44  ;;  %v9289_v63 = vcombine.high %v8990_v37, %v8997_v44 }
 0x53e   :  { %v9077_v53 = vrot.slane %v9070_v13, %v10517_v55  ;;  %v9085_v57 = vrot.slane %v9288_v24, %v10517_v55  ;;  %v9093_v16 = vrot.slane %v9086_v47, %v10517_v55  ;;  %v9101_v43 = vrot.slane %v9289_v63, %v10517_v55 }
 0x540   :  { %v9102_v54 = vcombine.low %v9077_v53, %v9085_v57  ;;  %v9118_v20 = vcombine.low %v9093_v16, %v9101_v43  ;;  %v9103_v59 = vcombine.high %v9077_v53, %v9085_v57  ;;  %v9119_v38 = vcombine.high %v9093_v16, %v9101_v43 }
 0x542   :  { %v11402_v56 = vrot.slane %v9102_v54, %v10519_v62  ;;  %v11405_v51 = vrot.slane %v9118_v20, %v10519_v62  ;;  %v11408_v45 = vrot.slane %v9103_v59, %v10519_v62  ;;  %v11411_v60 = vrot.slane %v9119_v38, %v10519_v62 }
 0x544   :  { %v7213_v61 = vpop.f32.mrf.mxu0  ;;  %v9135_v58 = vcombine.high %v11402_v56, %v11405_v51  ;;  %v9134_v0 = vcombine.low %v11402_v56, %v11405_v51  ;;  %v9137_v42 = vcombine.high %v11408_v45, %v11411_v60  ;;  %v9136_v4 = vcombine.low %v11408_v45, %v11411_v60 }
 0x546   :  { %9208 = vrot.lane.b32.xlu1 %v9135_v58, %s10280_s27  ;;  %v9980_v2 = vpop.f32.mrf.mxu0 }
 0x548   :  { %v7363_v39 = vpop.f32.mrf.mxu0 }
 0x54a   :  { %9216 = vrot.lane.b32.xlu1 %v9136_v4, %s10292_s21  ;;  %v9990_v40 = vpop.f32.mrf.mxu0 }
 0x54b   :  { %v7289_v5 = vpop.f32.mrf.mxu1 }
 0x54c   :  { %v7290_v6 = vadd.f32 %v7289_v5, %v7213_v61  ;;  %v7511_v1 = vpop.f32.mrf.mxu0 }
 0x54d   :  { %v9985_v3 = vpop.f32.mrf.mxu1 }
 0x54e   :  { %v7364_v49 = vadd.f32 %v7363_v39, %v7290_v6  ;;  %v10000_v7 = vpop.f32.mrf.mxu0 }
 0x54f   :  { %v7437_v52 = vpop.f32.mrf.mxu1 }
 0x550   :  { %v7438_v48 = vadd.f32 %v7437_v52, %v7364_v49 }
 0x551   :  { %v9995_v10 = vpop.f32.mrf.mxu1 }
 0x552   :  { %v7512_v11 = vadd.f32 %v7511_v1, %v7438_v48 }
 0x553   :  { %v7583_v12 = vpop.f32.mrf.mxu1 }
 0x554   :  { %v7584_v25 = vadd.f32 %v7583_v12, %v7512_v11 }
 0x555   :  { %v10005_v14 = vpop.f32.mrf.mxu1 }
 0x571   :  { %v7738_v15 = vpop.f32.mrf.mxu1 }
 0x573   :  { %v10015_v17 = vpop.f32.mrf.mxu1 }
 0x575   :  { %v7886_v18 = vpop.f32.mrf.mxu1 }
 0x577   :  { %v10025_v19 = vpop.f32.mrf.mxu1 }
 0x579   :  { %v7662_v8 = vpop.f32.mrf.mxu0  ;;  %v8032_v23 = vpop.f32.mrf.mxu1 }
 0x57a   :  { %v7739_v63 = vadd.f32 %v7738_v15, %v7662_v8 }
 0x57b   :  { %v10010_v46 = vpop.f32.mrf.mxu0  ;;  %v10035_v27 = vpop.f32.mrf.mxu1 }
 0x57d   :  { %v7812_v28 = vpop.f32.mrf.mxu0  ;;  %v8187_v29 = vpop.f32.mrf.mxu1 }
 0x57e   :  { %v7813_v16 = vadd.f32 %v7812_v28, %v7739_v63 }
 0x57f   :  { %v10020_v22 = vpop.f32.mrf.mxu0  ;;  %v10045_v31 = vpop.f32.mrf.mxu1 }
 0x580   :  { %v7887_v61 = vadd.f32 %v7886_v18, %v7813_v16 }
 0x581   :  { %v7960_v30 = vpop.f32.mrf.mxu0  ;;  %v8335_v21 = vpop.f32.mrf.mxu1 }
 0x582   :  { %v7961_v5 = vadd.f32 %v7960_v30, %v7887_v61 }
 0x583   :  { %v10030_v32 = vpop.f32.mrf.mxu0  ;;  %v10055_v33 = vpop.f32.mrf.mxu1 }
 0x584   :  { %v8033_v52 = vadd.f32 %v8032_v23, %v7961_v5 }
 0x585   :  { %v8111_v34 = vpop.f32.mrf.mxu0  ;;  %v8481_v9 = vpop.f32.mrf.mxu1 }
 0x586   :  { %v8188_v50 = vadd.f32 %v8187_v29, %v8111_v34 }
 0x587   :  { %v10040_v35 = vpop.f32.mrf.mxu0  ;;  %v10065_v41 = vpop.f32.mrf.mxu1 }
 0x589   :  { %v8261_v26 = vpop.f32.mrf.mxu0  ;;  %v8636_v36 = vpop.f32.mrf.mxu1 }
 0x58a   :  { %v8262_v13 = vadd.f32 %v8261_v26, %v8188_v50 }
 0x58b   :  { %v10050_v37 = vpop.f32.mrf.mxu0  ;;  %v10075_v44 = vpop.f32.mrf.mxu1 }
 0x58c   :  { %v8336_v43 = vadd.f32 %v8335_v21, %v8262_v13 }
 0x58d   :  { %v8409_v24 = vpop.f32.mrf.mxu0  ;;  %v8784_v47 = vpop.f32.mrf.mxu1 }
 0x58e   :  { %v8410_v58 = vadd.f32 %v8409_v24, %v8336_v43 }
 0x58f   :  { %v10060_v53 = vpop.f32.mrf.mxu0  ;;  %v10085_v57 = vpop.f32.mrf.mxu1 }
 0x590   :  { %v8482_v6 = vadd.f32 %v8481_v9, %v8410_v58 }
 0x591   :  { %v8560_v54 = vpop.f32.mrf.mxu0  ;;  %v8930_v20 = vpop.f32.mrf.mxu1 }
 0x592   :  { %v8637_v2 = vadd.f32 %v8636_v36, %v8560_v54  ;;  %v9002_v48 = vcombine.low %v7584_v25, %v8482_v6  ;;  %v9003_v10 = vcombine.high %v7584_v25, %v8482_v6 }
 0x593   :  { %v10070_v59 = vpop.f32.mrf.mxu0  ;;  %v10095_v38 = vpop.f32.mrf.mxu1 }
 0x594   :  { %v9010_v15 = vrot.slane %v9002_v48, %v10517_v55  ;;  %v9017_v17 = vrot.slane %v9003_v10, %v10517_v55 }
 0x595   :  { %v8710_v39 = vpop.f32.mrf.mxu0 }
 0x596   :  { %v8711_v4 = vadd.f32 %v8710_v39, %v8637_v2 }
 0x597   :  { %v10080_v40 = vpop.f32.mrf.mxu0 }
 0x598   :  { %v8785_v1 = vadd.f32 %v8784_v47, %v8711_v4 }
 0x599   :  { %v8858_v3 = vpop.f32.mrf.mxu0 }
 0x59a   :  { %v8859_v49 = vadd.f32 %v8858_v3, %v8785_v1 }
 0x59b   :  { %v10090_v7 = vpop.f32.mrf.mxu0 }
 0x59c   :  { %v8931_v11 = vadd.f32 %v8930_v20, %v8859_v49 }
 0x59e   :  { %v9018_v12 = vcombine.low %v8033_v52, %v8931_v11  ;;  %v9019_v14 = vcombine.high %v8033_v52, %v8931_v11 }
 0x5a0   :  { %v9026_v18 = vrot.slane %v9018_v12, %v10517_v55  ;;  %v9033_v19 = vrot.slane %v9019_v14, %v10517_v55 }
 0x5a2   :  { %v9034_v8 = vcombine.low %v9010_v15, %v9026_v18  ;;  %v9035_v46 = vcombine.high %v9010_v15, %v9026_v18  ;;  %v9050_v27 = vcombine.low %v9017_v17, %v9033_v19  ;;  %v9051_v28 = vcombine.high %v9017_v17, %v9033_v19 }
 0x5a4   :  { %v9042_v29 = vrot.slane %v9034_v8, %v10519_v62  ;;  %v9049_v23 = vrot.slane %v9035_v46, %v10519_v62  ;;  %v9058_v25 = vrot.slane %v9050_v27, %v10519_v62  ;;  %v9065_v22 = vrot.slane %v9051_v28, %v10519_v62 }
 0x5a6   :  { %v9138_v31 = vcombine.low %v9042_v29, %v9049_v23  ;;  %v9290_v30 = vcombine.high %v9042_v29, %v9049_v23  ;;  %v9154_v21 = vcombine.low %v9058_v25, %v9065_v22  ;;  %v9291_v32 = vcombine.high %v9058_v25, %v9065_v22 }
 0x5a8   :  { %v9145_v33 = vrot.slane %v9138_v31, %v10517_v55  ;;  %v9153_v34 = vrot.slane %v9290_v30, %v10517_v55  ;;  %v9161_v9 = vrot.slane %v9154_v21, %v10517_v55  ;;  %v9169_v35 = vrot.slane %v9291_v32, %v10517_v55 }
 0x5aa   :  { %v9171_v41 = vcombine.high %v9145_v33, %v9153_v34  ;;  %v9187_v26 = vcombine.high %v9161_v9, %v9169_v35  ;;  %v9170_v36 = vcombine.low %v9145_v33, %v9153_v34  ;;  %v9186_v50 = vcombine.low %v9161_v9, %v9169_v35 }
 0x5ac   :  { %v9185_v37 = vrot.slane %v9171_v41, %v10519_v62  ;;  %v9201_v44 = vrot.slane %v9187_v26, %v10519_v62  ;;  %v9178_v13 = vrot.slane %v9170_v36, %v10519_v62  ;;  %v9194_v24 = vrot.slane %v9186_v50, %v10519_v62 }
 0x5ad   :  { %10238 = shalt.err (!%p10235_p10)
}
 0x5ae   :  { %9263 = dma.vmem_to_hbm [thread:$0]  %s9258_s23, 1024, %s11469_s6, [#allocation12], %s10279_s26, %s10279_s26, %s10280_s27   ;;  %v9204_v55 = vcombine.low %v9185_v37, %v9201_v44  ;;  %v9203_v47 = vcombine.high %v9178_v13, %v9194_v24  ;;  %v9202_v63 = vcombine.low %v9178_v13, %v9194_v24  ;;  %v9205_v62 = vcombine.high %v9185_v37, %v9201_v44 }
 0x5af   :  { %s10294_s29 = smov 24   ;;  %vm9232_vm3 = vcmask 130048   ;;  %s10295_s6 = smov [#allocation10]   ;;  %vm9235_vm4 = vcmask 195584  }
 0x5b0   :  { %9218 = vrot.lane.b32.xlu1 %v9204_v55, %s10292_s21  ;;  %9210 = vrot.lane.b32.xlu0 %v9203_v47, %s10280_s27  ;;  %s9245_s30 = sshll.u32 %s10295_s6, 4  ;;  %s9246_s30 = int_to_ptr.vmem [resolvable:$true] %s9245_s30 }
 0x5b1   :  { %s10247_s7 = scalar_lea.vmem %s9246_s30, 256  ;;  %p10252_p12 = scmp.lt.s32.totalorder %s9246_s30, %s9246_s30 }
 0x5b2   :  { %p10248_p11 = scmp.ne.s32.totalorder %s9246_s30, %s10247_s7  ;;  %p10253_p13 = scmp.lt.s32.totalorder %s10247_s7, %s10247_s7 }
 0x5b4   :  { %9226 = vrot.lane.b32.xlu1 %v9205_v62, %s10294_s29  ;;  %9224 = vrot.lane.b32.xlu0 %v9137_v42, %s10294_s29  ;;  %p10254_p0 = por %p10253_p13, %p10252_p12 }
 0x5b6   :  { %p10255_p1 = pnand %p10254_p0, %p10248_p11 }
 0x5b8   :  { %v9209_v53 = vpop.permute.xlu1 %9208 }
 0x5b9   :  { %v9230_v20 = vsel %vm1619_vm2, %v9134_v0, %v9209_v53 }
 0x5bc   :  { %v9217_v57 = vpop.permute.xlu1 %9216 }
 0x5bd   :  { %v9233_v59 = vsel %vm9232_vm3, %v9230_v20, %v9217_v57 }
 0x622   :  { %v9219_v16 = vpop.permute.xlu1 %9218  ;;  %v9211_v43 = vpop.permute.xlu0 %9210 }
 0x623   :  { %v9231_v54 = vsel %vm1619_vm2, %v9202_v63, %v9211_v43 }
 0x624   :  { %v9234_v61 = vsel %vm9232_vm3, %v9231_v54, %v9219_v16 }
 0x626   :  { %v9227_v38 = vpop.permute.xlu1 %9226  ;;  %v9225_v45 = vpop.permute.xlu0 %9224 }
 0x627   :  { %v9237_v60 = vsel %vm9235_vm4, %v9234_v61, %v9227_v38  ;;  %v9236_v42 = vsel %vm9235_vm4, %v9233_v59, %v9225_v45 }
 0x628   :  { %9239 = vst.msk [vmem:[#allocation10 + $0x8] sm:$0xff] %vm94_vm0, %v9237_v60  ;;  %9238 = vst.msk [vmem:[#allocation10] sm:$0xff] %vm94_vm0, %v9236_v42 }
 0x629   :  { %10258 = shalt.err (!%p10255_p1)
}
 0x62a   :  { %9251 = dma.vmem_to_hbm [thread:$0]  %s9246_s30, 256, %s11468_s5, [#allocation4], %s10279_s26, %s10279_s26, %s10280_s27  }
 0x62b   :  { %10273 = dma.done.wait [#allocation4], 256  }
 0x62c   :  { %10274 = vsyncadd [#allocation4], 4294967040 }
 0x62d   :  { %10275 = dma.done.wait [#allocation12], 1024  }
 0x62e   :  { %10276 = vsyncadd [#allocation12], 4294966272 }
 0x62f   :  { %9270 = vsyncpa [#allocation3], 1 }
 0x630   :  { %9271 = vsyncpa [#allocation6], 1 }
 0x631   :  { %9272 = vsyncpa [#allocation9], 1 }
 0x632   :  { %9273 = vsyncpa [#allocation4], 1 }
 0x633   :  { %9274 = vsyncpa [#allocation12], 1 }

</bundles_post_ra>
